<compile_context>
chip_gen: v7x
topology: tpu7x:2x2x1
jax: 0.10.0
libtpu: 0.0.40
codegen_flags: <defaults>
</compile_context>

<pallas_src>
import functools
import math

import jax
import jax.numpy as jnp
from jax.experimental import pallas as pl
from jax.experimental.pallas import tpu as pltpu


def kan_kernel(x_ref,
               ln1_w_ref, ln1_b_ref,
               wqkv_ref,
               wp_ref, bp_ref,
               ln2_w_ref, ln2_b_ref,
               w1_ref, b1_ref,
               w2_ref, b2_ref,
               o_ref,
               *, num_heads, eps=1e-5, approx_gelu=False):
    Bb, N, C = x_ref.shape
    hd = C // num_heads
    rows = Bb * N
    scale = float(hd) ** -0.5
    f32 = jnp.float32
    bf16 = jnp.bfloat16

    def layernorm(v, w_ref, b_ref):
        mu = jnp.mean(v, axis=-1, keepdims=True)
        var = jnp.mean(jnp.square(v - mu), axis=-1, keepdims=True)
        return (v - mu) * jax.lax.rsqrt(var + eps) * w_ref[...] + b_ref[...]

    # Work on a 2-D (Bb*N, C) slab so every matmul has a fat M dimension.
    x2 = x_ref[...].astype(f32).reshape(rows, C)

    # ---------------- attention branch ----------------
    xn = layernorm(x2, ln1_w_ref, ln1_b_ref)                      # (rows, C) f32

    # Fused, lane-dense QKV projection: one (rows, C) @ (C, 3C) MXU pass.
    qkv = jnp.dot(xn.astype(bf16), wqkv_ref[...],
                  preferred_element_type=f32)                     # (rows, 3C) f32
    qkv3 = qkv.reshape(Bb, N, 3 * C).astype(bf16)                 # (Bb, N, 3C)

    o_heads = []
    for h in range(num_heads):   # static unroll; scores / PV stay per-head
        q_h = qkv3[:, :, h * hd:(h + 1) * hd]                     # (Bb, N, hd)
        k_h = qkv3[:, :, C + h * hd:C + (h + 1) * hd]
        v_h = qkv3[:, :, 2 * C + h * hd:2 * C + (h + 1) * hd]

        s = jnp.einsum('bnd,bmd->bnm', q_h, k_h,
                       preferred_element_type=f32) * scale        # (Bb, N, N) f32
        s = s - jnp.max(s, axis=-1, keepdims=True)
        p = jnp.exp(s)
        # approx reciprocal: intentional ~1e-3 rel error, runs on the EUP slot.
        p = p * pl.reciprocal(jnp.sum(p, axis=-1, keepdims=True), approx=True)

        o_heads.append(jnp.einsum('bnm,bmd->bnd', p.astype(bf16), v_h,
                                  preferred_element_type=f32))    # (Bb, N, hd) f32

    # Heads merged along lanes (PyTorch (head, hd) order), then ONE dense
    # (rows, C) @ (C, C) projection -- no per-head skinny matmuls, no
    # heads x (Bb, N, C) f32 intermediate, no cross-head reduction.
    o_cat = jnp.concatenate(o_heads, axis=-1).reshape(rows, C)
    attn = jnp.dot(o_cat.astype(bf16), wp_ref[...],
                   preferred_element_type=f32) + bp_ref[...]
    x2 = x2 + attn                                                # residual 1

    # ---------------- MLP branch ----------------
    xn2 = layernorm(x2, ln2_w_ref, ln2_b_ref)
    h1 = jnp.dot(xn2.astype(bf16), w1_ref[...],
                 preferred_element_type=f32) + b1_ref[...]
    if approx_gelu:
        h1 = jax.nn.gelu(h1, approximate=True)    # tanh GELU -> EUP (v5e option)
    else:
        # exact GELU (PyTorch nn.GELU() default), kept in f32
        h1 = 0.5 * h1 * (1.0 + jax.lax.erf(h1 * (1.0 / math.sqrt(2.0))))
    h2 = jnp.dot(h1.astype(bf16), w2_ref[...],
                 preferred_element_type=f32) + b2_ref[...]

    o_ref[...] = (x2 + h2).reshape(Bb, N, C).astype(o_ref.dtype)  # residual 2


def prepare_params(params):
    """Host-side weight prep: PyTorch (out,in) -> lane-dense (in,out) bf16
    matmul weights, f32 vector params."""
    return dict(
        ln1_w=params["ln1_w"].astype(jnp.float32).reshape(1, -1),
        ln1_b=params["ln1_b"].astype(jnp.float32).reshape(1, -1),
        ln2_w=params["ln2_w"].astype(jnp.float32).reshape(1, -1),
        ln2_b=params["ln2_b"].astype(jnp.float32).reshape(1, -1),
        wqkv=params["wqkv"].T.astype(jnp.bfloat16),    # (C, 3C), cols = (q|k|v) x (head, hd)
        wp=params["wproj"].T.astype(jnp.bfloat16),     # (C, C), rows = (head, hd)
        bp=params["bproj"].astype(jnp.float32).reshape(1, -1),
        w1=params["w1"].T.astype(jnp.bfloat16),        # (C, hidden)
        b1=params["b1"].astype(jnp.float32).reshape(1, -1),
        w2=params["w2"].T.astype(jnp.bfloat16),        # (hidden, C)
        b2=params["b2"].astype(jnp.float32).reshape(1, -1),
    )


def _vmem_bytes_estimate(block_b, N, C, hidden, num_heads):
    """Rough per-grid-step VMEM estimate (bytes)."""
    f32, bf16 = 4, 2
    rows = block_b * N
    io = 2 * 2 * rows * C * f32                                   # x + out, double-buffered
    weights = 2 * (3 * C * C + C * C + 2 * C * hidden) * bf16     # double-buffered weights
    weights += 2 * (3 * C + 2 * hidden + 4 * C) * f32             # biases / LN params
    inter = rows * (6 * C + 2 * hidden) * f32                     # live f32 activations
    inter += 2 * block_b * N * N * f32 * 2                        # per-head score tensors
    return io + weights + inter


def _pick_block_b(B, N, C, hidden, num_heads, budget_bytes=40 << 20):
    """Largest divisor of B that fits the VMEM budget while leaving >=2 grid
    steps when B >= 2 (so both v7x TensorCores get work; on v5e/v6e the extra
    step only costs ~0.35us)."""
    cap = B if B < 2 else B // 2
    best = 1
    for d in range(1, B + 1):
        if (B % d == 0 and d <= cap
                and _vmem_bytes_estimate(d, N, C, hidden, num_heads) <= budget_bytes):
            best = d
    return best


def kan_forward(x, params, num_heads, block_b=None, approx_gelu=False):
    B, N, C = x.shape
    assert C % num_heads == 0
    p = prepare_params(params)
    hidden = p["w1"].shape[1]

    if block_b is None:
        block_b = _pick_block_b(B, N, C, hidden, num_heads)
    assert B % block_b == 0
    grid = (B // block_b,)

    est = _vmem_bytes_estimate(block_b, N, C, hidden, num_heads)
    vmem_limit = int(min(56 << 20, max(32 << 20, 2 * est)))   # <= v7x physical 64 MiB

    def const(shape):
        zeros = (0,) * len(shape)
        return pl.BlockSpec(shape, lambda i, _z=zeros: _z)

    in_specs = [
        pl.BlockSpec((block_b, N, C), lambda i: (i, 0, 0)),   # x
        const((1, C)), const((1, C)),                         # ln1 w, b
        const((C, 3 * C)),                                    # fused qkv weight (lane-dense)
        const((C, C)), const((1, C)),                         # proj w, b
        const((1, C)), const((1, C)),                         # ln2 w, b
        const((C, hidden)), const((1, hidden)),               # mlp fc1
        const((hidden, C)), const((1, C)),                    # mlp fc2
    ]

    return pl.pallas_call(
        functools.partial(kan_kernel, num_heads=num_heads, approx_gelu=approx_gelu),
        out_shape=jax.ShapeDtypeStruct((B, N, C), x.dtype),
        grid=grid,
        in_specs=in_specs,
        out_specs=pl.BlockSpec((block_b, N, C), lambda i: (i, 0, 0)),
        compiler_params=pltpu.CompilerParams(
            dimension_semantics=("parallel",),
            vmem_limit_bytes=vmem_limit),
    )(x, p["ln1_w"], p["ln1_b"], p["wqkv"], p["wp"], p["bp"],
      p["ln2_w"], p["ln2_b"], p["w1"], p["b1"], p["w2"], p["b2"])


def kan_reference(x, p, num_heads):
    """Pure-JAX f32 reference mirroring the PyTorch forward (for verification)."""
    def ln(v, w, b):
        mu = v.mean(-1, keepdims=True)
        var = ((v - mu) ** 2).mean(-1, keepdims=True)
        return (v - mu) / jnp.sqrt(var + 1e-5) * w + b

    B, N, C = x.shape
    hd = C // num_heads
    xn = ln(x, p["ln1_w"][0], p["ln1_b"][0])
    qkv = xn @ p["wqkv"].T
    qkv = qkv.reshape(B, N, 3, num_heads, hd).transpose(2, 0, 3, 1, 4)
    q, k, v = qkv[0], qkv[1], qkv[2]
    attn = jax.nn.softmax((q @ k.transpose(0, 1, 3, 2)) * hd ** -0.5, axis=-1)
    out = (attn @ v).transpose(0, 2, 1, 3).reshape(B, N, C)
    out = out @ p["wproj"].T + p["bproj"][0]
    x = x + out
    xn2 = ln(x, p["ln2_w"][0], p["ln2_b"][0])
    h = xn2 @ p["w1"].T + p["b1"][0]
    h = 0.5 * h * (1.0 + jax.lax.erf(h / jnp.sqrt(2.0)))
    return x + h @ p["w2"].T + p["b2"][0]


if __name__ == "__main__":
    B, N, C = 2, 16, 64
    num_heads = 8
    mlp_ratio = 4.0
    hidden = int(C * mlp_ratio)

    key = jax.random.PRNGKey(0)
    ks = jax.random.split(key, 8)

    params = {
        # LayerNorms: PyTorch default init (weight=1, bias=0)
        "ln1_w": jnp.ones((1, C), jnp.float32),
        "ln1_b": jnp.zeros((1, C), jnp.float32),
        "ln2_w": jnp.ones((1, C), jnp.float32),
        "ln2_b": jnp.zeros((1, C), jnp.float32),
        # Linear weights in PyTorch (out, in) layout
        "wqkv":  0.05 * jax.random.normal(ks[1], (3 * C, C), jnp.float32),
        "wproj": 0.05 * jax.random.normal(ks[2], (C, C), jnp.float32),
        "bproj": 0.05 * jax.random.normal(ks[3], (1, C), jnp.float32),
        "w1":    0.05 * jax.random.normal(ks[4], (hidden, C), jnp.float32),
        "b1":    0.05 * jax.random.normal(ks[5], (1, hidden), jnp.float32),
        "w2":    0.05 * jax.random.normal(ks[6], (C, hidden), jnp.float32),
        "b2":    0.05 * jax.random.normal(ks[7], (1, C), jnp.float32),
    }

    x = jax.random.normal(ks[0], (B, N, C), jnp.float32)

    out = jax.block_until_ready(kan_forward(x, params, num_heads))
    ref = jax.block_until_ready(kan_reference(x, params, num_heads))

    assert out.shape == (B, N, C)
    # bf16 MXU inputs + approx softmax reciprocal -> loose tolerance vs. f32 ref.
    assert jnp.allclose(out, ref, atol=3e-2, rtol=3e-2), (
        float(jnp.max(jnp.abs(out - ref))))
    print("KERNEL_OK")
</pallas_src>

<mosaic_0001>
module attributes {stable_mosaic.version = 11 : i64} {
  func.func @kan_kernel(%arg0: i32, %arg1: memref<1x16x64xf32, #tpu.memory_space<vmem>>, %arg2: memref<1x64xf32, #tpu.memory_space<vmem>>, %arg3: memref<1x64xf32, #tpu.memory_space<vmem>>, %arg4: memref<64x192xbf16, #tpu.memory_space<vmem>>, %arg5: memref<64x64xbf16, #tpu.memory_space<vmem>>, %arg6: memref<1x64xf32, #tpu.memory_space<vmem>>, %arg7: memref<1x64xf32, #tpu.memory_space<vmem>>, %arg8: memref<1x64xf32, #tpu.memory_space<vmem>>, %arg9: memref<64x256xbf16, #tpu.memory_space<vmem>>, %arg10: memref<1x256xf32, #tpu.memory_space<vmem>>, %arg11: memref<256x64xbf16, #tpu.memory_space<vmem>>, %arg12: memref<1x64xf32, #tpu.memory_space<vmem>>, %arg13: memref<1x16x64xf32, #tpu.memory_space<vmem>>) attributes {dimension_semantics = [#tpu.dimension_semantics<parallel>], iteration_bounds = array<i64: 2>, scalar_prefetch = 0 : i64, scratch_operands = 0 : i64, tpu.core_type = #tpu.core_type<tc>, window_params = [{transform_indices = @transform_0, window_bounds = array<i64: 1, 16, 64>}, {pipeline_mode = #tpu.pipeline_mode<synchronous>, transform_indices = @transform_1, window_bounds = array<i64: 1, 64>}, {pipeline_mode = #tpu.pipeline_mode<synchronous>, transform_indices = @transform_2, window_bounds = array<i64: 1, 64>}, {pipeline_mode = #tpu.pipeline_mode<synchronous>, transform_indices = @transform_3, window_bounds = array<i64: 64, 192>}, {pipeline_mode = #tpu.pipeline_mode<synchronous>, transform_indices = @transform_4, window_bounds = array<i64: 64, 64>}, {pipeline_mode = #tpu.pipeline_mode<synchronous>, transform_indices = @transform_5, window_bounds = array<i64: 1, 64>}, {pipeline_mode = #tpu.pipeline_mode<synchronous>, transform_indices = @transform_6, window_bounds = array<i64: 1, 64>}, {pipeline_mode = #tpu.pipeline_mode<synchronous>, transform_indices = @transform_7, window_bounds = array<i64: 1, 64>}, {pipeline_mode = #tpu.pipeline_mode<synchronous>, transform_indices = @transform_8, window_bounds = array<i64: 64, 256>}, {pipeline_mode = #tpu.pipeline_mode<synchronous>, transform_indices = @transform_9, window_bounds = array<i64: 1, 256>}, {pipeline_mode = #tpu.pipeline_mode<synchronous>, transform_indices = @transform_10, window_bounds = array<i64: 256, 64>}, {pipeline_mode = #tpu.pipeline_mode<synchronous>, transform_indices = @transform_11, window_bounds = array<i64: 1, 64>}, {transform_indices = @transform_12, window_bounds = array<i64: 1, 16, 64>}]} {
    %c0 = arith.constant 0 : index
    %c0_0 = arith.constant 0 : index
    %c0_1 = arith.constant 0 : index
    %0 = vector.load %arg1[%c0, %c0_0, %c0_1] : memref<1x16x64xf32, #tpu.memory_space<vmem>>, vector<1x16x64xf32>
    %1 = vector.shape_cast %0 : vector<1x16x64xf32> to vector<16x64xf32>
    %cst = arith.constant dense<0.000000e+00> : vector<16xf32>
    %2 = vector.multi_reduction <add>, %1, %cst [1] : vector<16x64xf32> to vector<16xf32>
    %3 = vector.shape_cast %2 : vector<16xf32> to vector<16x1xf32>
    %cst_2 = arith.constant 6.400000e+01 : f32
    %4 = vector.broadcast %cst_2 : f32 to vector<16x1xf32>
    %5 = arith.divf %3, %4 : vector<16x1xf32>
    %6 = vector.broadcast %5 : vector<16x1xf32> to vector<16x64xf32>
    %7 = arith.subf %1, %6 : vector<16x64xf32>
    %8 = arith.mulf %7, %7 : vector<16x64xf32>
    %cst_3 = arith.constant dense<0.000000e+00> : vector<16xf32>
    %9 = vector.multi_reduction <add>, %8, %cst_3 [1] : vector<16x64xf32> to vector<16xf32>
    %10 = vector.shape_cast %9 : vector<16xf32> to vector<16x1xf32>
    %cst_4 = arith.constant 6.400000e+01 : f32
    %11 = vector.broadcast %cst_4 : f32 to vector<16x1xf32>
    %12 = arith.divf %10, %11 : vector<16x1xf32>
    %13 = vector.broadcast %5 : vector<16x1xf32> to vector<16x64xf32>
    %14 = arith.subf %1, %13 : vector<16x64xf32>
    %cst_5 = arith.constant 9.99999974E-6 : f32
    %15 = vector.broadcast %cst_5 : f32 to vector<16x1xf32>
    %16 = arith.addf %12, %15 : vector<16x1xf32>
    %17 = math.rsqrt %16 : vector<16x1xf32>
    %18 = vector.broadcast %17 : vector<16x1xf32> to vector<16x64xf32>
    %19 = arith.mulf %14, %18 : vector<16x64xf32>
    %c0_6 = arith.constant 0 : index
    %c0_7 = arith.constant 0 : index
    %20 = vector.load %arg2[%c0_6, %c0_7] : memref<1x64xf32, #tpu.memory_space<vmem>>, vector<1x64xf32>
    %21 = vector.broadcast %20 : vector<1x64xf32> to vector<16x64xf32>
    %22 = arith.mulf %19, %21 : vector<16x64xf32>
    %c0_8 = arith.constant 0 : index
    %c0_9 = arith.constant 0 : index
    %23 = vector.load %arg3[%c0_8, %c0_9] : memref<1x64xf32, #tpu.memory_space<vmem>>, vector<1x64xf32>
    %24 = vector.broadcast %23 : vector<1x64xf32> to vector<16x64xf32>
    %25 = arith.addf %22, %24 : vector<16x64xf32>
    %26 = arith.truncf %25 : vector<16x64xf32> to vector<16x64xbf16>
    %c0_10 = arith.constant 0 : index
    %c0_11 = arith.constant 0 : index
    %27 = vector.load %arg4[%c0_10, %c0_11] : memref<64x192xbf16, #tpu.memory_space<vmem>>, vector<64x192xbf16>
    %cst_12 = arith.constant dense<0.000000e+00> : vector<16x192xf32>
    %28 = tpu.matmul %26, %27, %cst_12 {dimension_numbers = #tpu.dot_dimension_numbers<[1], [0], [0], [1], [0, 0, 1, 1], [], []>} : vector<16x64xbf16>, vector<64x192xbf16>, vector<16x192xf32> -> vector<16x192xf32>
    %29 = vector.shape_cast %28 : vector<16x192xf32> to vector<1x16x192xf32>
    %30 = arith.truncf %29 : vector<1x16x192xf32> to vector<1x16x192xbf16>
    %31 = vector.extract_strided_slice %30 {offsets = [0, 0, 0], sizes = [1, 16, 8], strides = [1, 1, 1]} : vector<1x16x192xbf16> to vector<1x16x8xbf16>
    %32 = vector.extract_strided_slice %30 {offsets = [0, 0, 64], sizes = [1, 16, 8], strides = [1, 1, 1]} : vector<1x16x192xbf16> to vector<1x16x8xbf16>
    %33 = vector.extract_strided_slice %30 {offsets = [0, 0, 128], sizes = [1, 16, 8], strides = [1, 1, 1]} : vector<1x16x192xbf16> to vector<1x16x8xbf16>
    "tpu.trace_start"() <{level = 10 : i32, message = "bnd,bmd->bnm"}> : () -> ()
    %cst_13 = arith.constant dense<0.000000e+00> : vector<1x16x16xf32>
    %34 = tpu.matmul %31, %32, %cst_13 {dimension_numbers = #tpu.dot_dimension_numbers<[2], [2], [1], [1], [0, 0, 0, 1, 1, 1], [0], [0]>} : vector<1x16x8xbf16>, vector<1x16x8xbf16>, vector<1x16x16xf32> -> vector<1x16x16xf32>
    "tpu.trace_stop"() : () -> ()
    %cst_14 = arith.constant 0.353553385 : f32
    %35 = vector.broadcast %cst_14 : f32 to vector<1x16x16xf32>
    %36 = arith.mulf %34, %35 : vector<1x16x16xf32>
    %cst_15 = arith.constant dense<0xFF800000> : vector<1x16xf32>
    %37 = vector.multi_reduction <maximumf>, %36, %cst_15 [2] : vector<1x16x16xf32> to vector<1x16xf32>
    %38 = vector.shape_cast %37 : vector<1x16xf32> to vector<1x16x1xf32>
    %39 = vector.broadcast %38 : vector<1x16x1xf32> to vector<1x16x16xf32>
    %40 = arith.subf %36, %39 : vector<1x16x16xf32>
    %41 = math.exp %40 : vector<1x16x16xf32>
    %cst_16 = arith.constant dense<0.000000e+00> : vector<1x16xf32>
    %42 = vector.multi_reduction <add>, %41, %cst_16 [2] : vector<1x16x16xf32> to vector<1x16xf32>
    %43 = vector.shape_cast %42 : vector<1x16xf32> to vector<1x16x1xf32>
    %44 = tpu.reciprocal %43 {approx = true} : vector<1x16x1xf32> -> vector<1x16x1xf32>
    %45 = vector.broadcast %44 : vector<1x16x1xf32> to vector<1x16x16xf32>
    %46 = arith.mulf %41, %45 : vector<1x16x16xf32>
    %47 = arith.truncf %46 : vector<1x16x16xf32> to vector<1x16x16xbf16>
    "tpu.trace_start"() <{level = 10 : i32, message = "bnm,bmd->bnd"}> : () -> ()
    %cst_17 = arith.constant dense<0.000000e+00> : vector<1x16x8xf32>
    %48 = tpu.matmul %47, %33, %cst_17 {dimension_numbers = #tpu.dot_dimension_numbers<[2], [1], [1], [2], [0, 0, 0, 1, 1, 2], [0], [0]>} : vector<1x16x16xbf16>, vector<1x16x8xbf16>, vector<1x16x8xf32> -> vector<1x16x8xf32>
    "tpu.trace_stop"() : () -> ()
    %49 = vector.extract_strided_slice %30 {offsets = [0, 0, 8], sizes = [1, 16, 8], strides = [1, 1, 1]} : vector<1x16x192xbf16> to vector<1x16x8xbf16>
    %50 = vector.extract_strided_slice %30 {offsets = [0, 0, 72], sizes = [1, 16, 8], strides = [1, 1, 1]} : vector<1x16x192xbf16> to vector<1x16x8xbf16>
    %51 = vector.extract_strided_slice %30 {offsets = [0, 0, 136], sizes = [1, 16, 8], strides = [1, 1, 1]} : vector<1x16x192xbf16> to vector<1x16x8xbf16>
    "tpu.trace_start"() <{level = 10 : i32, message = "bnd,bmd->bnm"}> : () -> ()
    %cst_18 = arith.constant dense<0.000000e+00> : vector<1x16x16xf32>
    %52 = tpu.matmul %49, %50, %cst_18 {dimension_numbers = #tpu.dot_dimension_numbers<[2], [2], [1], [1], [0, 0, 0, 1, 1, 1], [0], [0]>} : vector<1x16x8xbf16>, vector<1x16x8xbf16>, vector<1x16x16xf32> -> vector<1x16x16xf32>
    "tpu.trace_stop"() : () -> ()
    %cst_19 = arith.constant 0.353553385 : f32
    %53 = vector.broadcast %cst_19 : f32 to vector<1x16x16xf32>
    %54 = arith.mulf %52, %53 : vector<1x16x16xf32>
    %cst_20 = arith.constant dense<0xFF800000> : vector<1x16xf32>
    %55 = vector.multi_reduction <maximumf>, %54, %cst_20 [2] : vector<1x16x16xf32> to vector<1x16xf32>
    %56 = vector.shape_cast %55 : vector<1x16xf32> to vector<1x16x1xf32>
    %57 = vector.broadcast %56 : vector<1x16x1xf32> to vector<1x16x16xf32>
    %58 = arith.subf %54, %57 : vector<1x16x16xf32>
    %59 = math.exp %58 : vector<1x16x16xf32>
    %cst_21 = arith.constant dense<0.000000e+00> : vector<1x16xf32>
    %60 = vector.multi_reduction <add>, %59, %cst_21 [2] : vector<1x16x16xf32> to vector<1x16xf32>
    %61 = vector.shape_cast %60 : vector<1x16xf32> to vector<1x16x1xf32>
    %62 = tpu.reciprocal %61 {approx = true} : vector<1x16x1xf32> -> vector<1x16x1xf32>
    %63 = vector.broadcast %62 : vector<1x16x1xf32> to vector<1x16x16xf32>
    %64 = arith.mulf %59, %63 : vector<1x16x16xf32>
    %65 = arith.truncf %64 : vector<1x16x16xf32> to vector<1x16x16xbf16>
    "tpu.trace_start"() <{level = 10 : i32, message = "bnm,bmd->bnd"}> : () -> ()
    %cst_22 = arith.constant dense<0.000000e+00> : vector<1x16x8xf32>
    %66 = tpu.matmul %65, %51, %cst_22 {dimension_numbers = #tpu.dot_dimension_numbers<[2], [1], [1], [2], [0, 0, 0, 1, 1, 2], [0], [0]>} : vector<1x16x16xbf16>, vector<1x16x8xbf16>, vector<1x16x8xf32> -> vector<1x16x8xf32>
    "tpu.trace_stop"() : () -> ()
    %67 = vector.extract_strided_slice %30 {offsets = [0, 0, 16], sizes = [1, 16, 8], strides = [1, 1, 1]} : vector<1x16x192xbf16> to vector<1x16x8xbf16>
    %68 = vector.extract_strided_slice %30 {offsets = [0, 0, 80], sizes = [1, 16, 8], strides = [1, 1, 1]} : vector<1x16x192xbf16> to vector<1x16x8xbf16>
    %69 = vector.extract_strided_slice %30 {offsets = [0, 0, 144], sizes = [1, 16, 8], strides = [1, 1, 1]} : vector<1x16x192xbf16> to vector<1x16x8xbf16>
    "tpu.trace_start"() <{level = 10 : i32, message = "bnd,bmd->bnm"}> : () -> ()
    %cst_23 = arith.constant dense<0.000000e+00> : vector<1x16x16xf32>
    %70 = tpu.matmul %67, %68, %cst_23 {dimension_numbers = #tpu.dot_dimension_numbers<[2], [2], [1], [1], [0, 0, 0, 1, 1, 1], [0], [0]>} : vector<1x16x8xbf16>, vector<1x16x8xbf16>, vector<1x16x16xf32> -> vector<1x16x16xf32>
    "tpu.trace_stop"() : () -> ()
    %cst_24 = arith.constant 0.353553385 : f32
    %71 = vector.broadcast %cst_24 : f32 to vector<1x16x16xf32>
    %72 = arith.mulf %70, %71 : vector<1x16x16xf32>
    %cst_25 = arith.constant dense<0xFF800000> : vector<1x16xf32>
    %73 = vector.multi_reduction <maximumf>, %72, %cst_25 [2] : vector<1x16x16xf32> to vector<1x16xf32>
    %74 = vector.shape_cast %73 : vector<1x16xf32> to vector<1x16x1xf32>
    %75 = vector.broadcast %74 : vector<1x16x1xf32> to vector<1x16x16xf32>
    %76 = arith.subf %72, %75 : vector<1x16x16xf32>
    %77 = math.exp %76 : vector<1x16x16xf32>
    %cst_26 = arith.constant dense<0.000000e+00> : vector<1x16xf32>
    %78 = vector.multi_reduction <add>, %77, %cst_26 [2] : vector<1x16x16xf32> to vector<1x16xf32>
    %79 = vector.shape_cast %78 : vector<1x16xf32> to vector<1x16x1xf32>
    %80 = tpu.reciprocal %79 {approx = true} : vector<1x16x1xf32> -> vector<1x16x1xf32>
    %81 = vector.broadcast %80 : vector<1x16x1xf32> to vector<1x16x16xf32>
    %82 = arith.mulf %77, %81 : vector<1x16x16xf32>
    %83 = arith.truncf %82 : vector<1x16x16xf32> to vector<1x16x16xbf16>
    "tpu.trace_start"() <{level = 10 : i32, message = "bnm,bmd->bnd"}> : () -> ()
    %cst_27 = arith.constant dense<0.000000e+00> : vector<1x16x8xf32>
    %84 = tpu.matmul %83, %69, %cst_27 {dimension_numbers = #tpu.dot_dimension_numbers<[2], [1], [1], [2], [0, 0, 0, 1, 1, 2], [0], [0]>} : vector<1x16x16xbf16>, vector<1x16x8xbf16>, vector<1x16x8xf32> -> vector<1x16x8xf32>
    "tpu.trace_stop"() : () -> ()
    %85 = vector.extract_strided_slice %30 {offsets = [0, 0, 24], sizes = [1, 16, 8], strides = [1, 1, 1]} : vector<1x16x192xbf16> to vector<1x16x8xbf16>
    %86 = vector.extract_strided_slice %30 {offsets = [0, 0, 88], sizes = [1, 16, 8], strides = [1, 1, 1]} : vector<1x16x192xbf16> to vector<1x16x8xbf16>
    %87 = vector.extract_strided_slice %30 {offsets = [0, 0, 152], sizes = [1, 16, 8], strides = [1, 1, 1]} : vector<1x16x192xbf16> to vector<1x16x8xbf16>
    "tpu.trace_start"() <{level = 10 : i32, message = "bnd,bmd->bnm"}> : () -> ()
    %cst_28 = arith.constant dense<0.000000e+00> : vector<1x16x16xf32>
    %88 = tpu.matmul %85, %86, %cst_28 {dimension_numbers = #tpu.dot_dimension_numbers<[2], [2], [1], [1], [0, 0, 0, 1, 1, 1], [0], [0]>} : vector<1x16x8xbf16>, vector<1x16x8xbf16>, vector<1x16x16xf32> -> vector<1x16x16xf32>
    "tpu.trace_stop"() : () -> ()
    %cst_29 = arith.constant 0.353553385 : f32
    %89 = vector.broadcast %cst_29 : f32 to vector<1x16x16xf32>
    %90 = arith.mulf %88, %89 : vector<1x16x16xf32>
    %cst_30 = arith.constant dense<0xFF800000> : vector<1x16xf32>
    %91 = vector.multi_reduction <maximumf>, %90, %cst_30 [2] : vector<1x16x16xf32> to vector<1x16xf32>
    %92 = vector.shape_cast %91 : vector<1x16xf32> to vector<1x16x1xf32>
    %93 = vector.broadcast %92 : vector<1x16x1xf32> to vector<1x16x16xf32>
    %94 = arith.subf %90, %93 : vector<1x16x16xf32>
    %95 = math.exp %94 : vector<1x16x16xf32>
    %cst_31 = arith.constant dense<0.000000e+00> : vector<1x16xf32>
    %96 = vector.multi_reduction <add>, %95, %cst_31 [2] : vector<1x16x16xf32> to vector<1x16xf32>
    %97 = vector.shape_cast %96 : vector<1x16xf32> to vector<1x16x1xf32>
    %98 = tpu.reciprocal %97 {approx = true} : vector<1x16x1xf32> -> vector<1x16x1xf32>
    %99 = vector.broadcast %98 : vector<1x16x1xf32> to vector<1x16x16xf32>
    %100 = arith.mulf %95, %99 : vector<1x16x16xf32>
    %101 = arith.truncf %100 : vector<1x16x16xf32> to vector<1x16x16xbf16>
    "tpu.trace_start"() <{level = 10 : i32, message = "bnm,bmd->bnd"}> : () -> ()
    %cst_32 = arith.constant dense<0.000000e+00> : vector<1x16x8xf32>
    %102 = tpu.matmul %101, %87, %cst_32 {dimension_numbers = #tpu.dot_dimension_numbers<[2], [1], [1], [2], [0, 0, 0, 1, 1, 2], [0], [0]>} : vector<1x16x16xbf16>, vector<1x16x8xbf16>, vector<1x16x8xf32> -> vector<1x16x8xf32>
    "tpu.trace_stop"() : () -> ()
    %103 = vector.extract_strided_slice %30 {offsets = [0, 0, 32], sizes = [1, 16, 8], strides = [1, 1, 1]} : vector<1x16x192xbf16> to vector<1x16x8xbf16>
    %104 = vector.extract_strided_slice %30 {offsets = [0, 0, 96], sizes = [1, 16, 8], strides = [1, 1, 1]} : vector<1x16x192xbf16> to vector<1x16x8xbf16>
    %105 = vector.extract_strided_slice %30 {offsets = [0, 0, 160], sizes = [1, 16, 8], strides = [1, 1, 1]} : vector<1x16x192xbf16> to vector<1x16x8xbf16>
    "tpu.trace_start"() <{level = 10 : i32, message = "bnd,bmd->bnm"}> : () -> ()
    %cst_33 = arith.constant dense<0.000000e+00> : vector<1x16x16xf32>
    %106 = tpu.matmul %103, %104, %cst_33 {dimension_numbers = #tpu.dot_dimension_numbers<[2], [2], [1], [1], [0, 0, 0, 1, 1, 1], [0], [0]>} : vector<1x16x8xbf16>, vector<1x16x8xbf16>, vector<1x16x16xf32> -> vector<1x16x16xf32>
    "tpu.trace_stop"() : () -> ()
    %cst_34 = arith.constant 0.353553385 : f32
    %107 = vector.broadcast %cst_34 : f32 to vector<1x16x16xf32>
    %108 = arith.mulf %106, %107 : vector<1x16x16xf32>
    %cst_35 = arith.constant dense<0xFF800000> : vector<1x16xf32>
    %109 = vector.multi_reduction <maximumf>, %108, %cst_35 [2] : vector<1x16x16xf32> to vector<1x16xf32>
    %110 = vector.shape_cast %109 : vector<1x16xf32> to vector<1x16x1xf32>
    %111 = vector.broadcast %110 : vector<1x16x1xf32> to vector<1x16x16xf32>
    %112 = arith.subf %108, %111 : vector<1x16x16xf32>
    %113 = math.exp %112 : vector<1x16x16xf32>
    %cst_36 = arith.constant dense<0.000000e+00> : vector<1x16xf32>
    %114 = vector.multi_reduction <add>, %113, %cst_36 [2] : vector<1x16x16xf32> to vector<1x16xf32>
    %115 = vector.shape_cast %114 : vector<1x16xf32> to vector<1x16x1xf32>
    %116 = tpu.reciprocal %115 {approx = true} : vector<1x16x1xf32> -> vector<1x16x1xf32>
    %117 = vector.broadcast %116 : vector<1x16x1xf32> to vector<1x16x16xf32>
    %118 = arith.mulf %113, %117 : vector<1x16x16xf32>
    %119 = arith.truncf %118 : vector<1x16x16xf32> to vector<1x16x16xbf16>
    "tpu.trace_start"() <{level = 10 : i32, message = "bnm,bmd->bnd"}> : () -> ()
    %cst_37 = arith.constant dense<0.000000e+00> : vector<1x16x8xf32>
    %120 = tpu.matmul %119, %105, %cst_37 {dimension_numbers = #tpu.dot_dimension_numbers<[2], [1], [1], [2], [0, 0, 0, 1, 1, 2], [0], [0]>} : vector<1x16x16xbf16>, vector<1x16x8xbf16>, vector<1x16x8xf32> -> vector<1x16x8xf32>
    "tpu.trace_stop"() : () -> ()
    %121 = vector.extract_strided_slice %30 {offsets = [0, 0, 40], sizes = [1, 16, 8], strides = [1, 1, 1]} : vector<1x16x192xbf16> to vector<1x16x8xbf16>
    %122 = vector.extract_strided_slice %30 {offsets = [0, 0, 104], sizes = [1, 16, 8], strides = [1, 1, 1]} : vector<1x16x192xbf16> to vector<1x16x8xbf16>
    %123 = vector.extract_strided_slice %30 {offsets = [0, 0, 168], sizes = [1, 16, 8], strides = [1, 1, 1]} : vector<1x16x192xbf16> to vector<1x16x8xbf16>
    "tpu.trace_start"() <{level = 10 : i32, message = "bnd,bmd->bnm"}> : () -> ()
    %cst_38 = arith.constant dense<0.000000e+00> : vector<1x16x16xf32>
    %124 = tpu.matmul %121, %122, %cst_38 {dimension_numbers = #tpu.dot_dimension_numbers<[2], [2], [1], [1], [0, 0, 0, 1, 1, 1], [0], [0]>} : vector<1x16x8xbf16>, vector<1x16x8xbf16>, vector<1x16x16xf32> -> vector<1x16x16xf32>
    "tpu.trace_stop"() : () -> ()
    %cst_39 = arith.constant 0.353553385 : f32
    %125 = vector.broadcast %cst_39 : f32 to vector<1x16x16xf32>
    %126 = arith.mulf %124, %125 : vector<1x16x16xf32>
    %cst_40 = arith.constant dense<0xFF800000> : vector<1x16xf32>
    %127 = vector.multi_reduction <maximumf>, %126, %cst_40 [2] : vector<1x16x16xf32> to vector<1x16xf32>
    %128 = vector.shape_cast %127 : vector<1x16xf32> to vector<1x16x1xf32>
    %129 = vector.broadcast %128 : vector<1x16x1xf32> to vector<1x16x16xf32>
    %130 = arith.subf %126, %129 : vector<1x16x16xf32>
    %131 = math.exp %130 : vector<1x16x16xf32>
    %cst_41 = arith.constant dense<0.000000e+00> : vector<1x16xf32>
    %132 = vector.multi_reduction <add>, %131, %cst_41 [2] : vector<1x16x16xf32> to vector<1x16xf32>
    %133 = vector.shape_cast %132 : vector<1x16xf32> to vector<1x16x1xf32>
    %134 = tpu.reciprocal %133 {approx = true} : vector<1x16x1xf32> -> vector<1x16x1xf32>
    %135 = vector.broadcast %134 : vector<1x16x1xf32> to vector<1x16x16xf32>
    %136 = arith.mulf %131, %135 : vector<1x16x16xf32>
    %137 = arith.truncf %136 : vector<1x16x16xf32> to vector<1x16x16xbf16>
    "tpu.trace_start"() <{level = 10 : i32, message = "bnm,bmd->bnd"}> : () -> ()
    %cst_42 = arith.constant dense<0.000000e+00> : vector<1x16x8xf32>
    %138 = tpu.matmul %137, %123, %cst_42 {dimension_numbers = #tpu.dot_dimension_numbers<[2], [1], [1], [2], [0, 0, 0, 1, 1, 2], [0], [0]>} : vector<1x16x16xbf16>, vector<1x16x8xbf16>, vector<1x16x8xf32> -> vector<1x16x8xf32>
    "tpu.trace_stop"() : () -> ()
    %139 = vector.extract_strided_slice %30 {offsets = [0, 0, 48], sizes = [1, 16, 8], strides = [1, 1, 1]} : vector<1x16x192xbf16> to vector<1x16x8xbf16>
    %140 = vector.extract_strided_slice %30 {offsets = [0, 0, 112], sizes = [1, 16, 8], strides = [1, 1, 1]} : vector<1x16x192xbf16> to vector<1x16x8xbf16>
    %141 = vector.extract_strided_slice %30 {offsets = [0, 0, 176], sizes = [1, 16, 8], strides = [1, 1, 1]} : vector<1x16x192xbf16> to vector<1x16x8xbf16>
    "tpu.trace_start"() <{level = 10 : i32, message = "bnd,bmd->bnm"}> : () -> ()
    %cst_43 = arith.constant dense<0.000000e+00> : vector<1x16x16xf32>
    %142 = tpu.matmul %139, %140, %cst_43 {dimension_numbers = #tpu.dot_dimension_numbers<[2], [2], [1], [1], [0, 0, 0, 1, 1, 1], [0], [0]>} : vector<1x16x8xbf16>, vector<1x16x8xbf16>, vector<1x16x16xf32> -> vector<1x16x16xf32>
    "tpu.trace_stop"() : () -> ()
    %cst_44 = arith.constant 0.353553385 : f32
    %143 = vector.broadcast %cst_44 : f32 to vector<1x16x16xf32>
    %144 = arith.mulf %142, %143 : vector<1x16x16xf32>
    %cst_45 = arith.constant dense<0xFF800000> : vector<1x16xf32>
    %145 = vector.multi_reduction <maximumf>, %144, %cst_45 [2] : vector<1x16x16xf32> to vector<1x16xf32>
    %146 = vector.shape_cast %145 : vector<1x16xf32> to vector<1x16x1xf32>
    %147 = vector.broadcast %146 : vector<1x16x1xf32> to vector<1x16x16xf32>
    %148 = arith.subf %144, %147 : vector<1x16x16xf32>
    %149 = math.exp %148 : vector<1x16x16xf32>
    %cst_46 = arith.constant dense<0.000000e+00> : vector<1x16xf32>
    %150 = vector.multi_reduction <add>, %149, %cst_46 [2] : vector<1x16x16xf32> to vector<1x16xf32>
    %151 = vector.shape_cast %150 : vector<1x16xf32> to vector<1x16x1xf32>
    %152 = tpu.reciprocal %151 {approx = true} : vector<1x16x1xf32> -> vector<1x16x1xf32>
    %153 = vector.broadcast %152 : vector<1x16x1xf32> to vector<1x16x16xf32>
    %154 = arith.mulf %149, %153 : vector<1x16x16xf32>
    %155 = arith.truncf %154 : vector<1x16x16xf32> to vector<1x16x16xbf16>
    "tpu.trace_start"() <{level = 10 : i32, message = "bnm,bmd->bnd"}> : () -> ()
    %cst_47 = arith.constant dense<0.000000e+00> : vector<1x16x8xf32>
    %156 = tpu.matmul %155, %141, %cst_47 {dimension_numbers = #tpu.dot_dimension_numbers<[2], [1], [1], [2], [0, 0, 0, 1, 1, 2], [0], [0]>} : vector<1x16x16xbf16>, vector<1x16x8xbf16>, vector<1x16x8xf32> -> vector<1x16x8xf32>
    "tpu.trace_stop"() : () -> ()
    %157 = vector.extract_strided_slice %30 {offsets = [0, 0, 56], sizes = [1, 16, 8], strides = [1, 1, 1]} : vector<1x16x192xbf16> to vector<1x16x8xbf16>
    %158 = vector.extract_strided_slice %30 {offsets = [0, 0, 120], sizes = [1, 16, 8], strides = [1, 1, 1]} : vector<1x16x192xbf16> to vector<1x16x8xbf16>
    %159 = vector.extract_strided_slice %30 {offsets = [0, 0, 184], sizes = [1, 16, 8], strides = [1, 1, 1]} : vector<1x16x192xbf16> to vector<1x16x8xbf16>
    "tpu.trace_start"() <{level = 10 : i32, message = "bnd,bmd->bnm"}> : () -> ()
    %cst_48 = arith.constant dense<0.000000e+00> : vector<1x16x16xf32>
    %160 = tpu.matmul %157, %158, %cst_48 {dimension_numbers = #tpu.dot_dimension_numbers<[2], [2], [1], [1], [0, 0, 0, 1, 1, 1], [0], [0]>} : vector<1x16x8xbf16>, vector<1x16x8xbf16>, vector<1x16x16xf32> -> vector<1x16x16xf32>
    "tpu.trace_stop"() : () -> ()
    %cst_49 = arith.constant 0.353553385 : f32
    %161 = vector.broadcast %cst_49 : f32 to vector<1x16x16xf32>
    %162 = arith.mulf %160, %161 : vector<1x16x16xf32>
    %cst_50 = arith.constant dense<0xFF800000> : vector<1x16xf32>
    %163 = vector.multi_reduction <maximumf>, %162, %cst_50 [2] : vector<1x16x16xf32> to vector<1x16xf32>
    %164 = vector.shape_cast %163 : vector<1x16xf32> to vector<1x16x1xf32>
    %165 = vector.broadcast %164 : vector<1x16x1xf32> to vector<1x16x16xf32>
    %166 = arith.subf %162, %165 : vector<1x16x16xf32>
    %167 = math.exp %166 : vector<1x16x16xf32>
    %cst_51 = arith.constant dense<0.000000e+00> : vector<1x16xf32>
    %168 = vector.multi_reduction <add>, %167, %cst_51 [2] : vector<1x16x16xf32> to vector<1x16xf32>
    %169 = vector.shape_cast %168 : vector<1x16xf32> to vector<1x16x1xf32>
    %170 = tpu.reciprocal %169 {approx = true} : vector<1x16x1xf32> -> vector<1x16x1xf32>
    %171 = vector.broadcast %170 : vector<1x16x1xf32> to vector<1x16x16xf32>
    %172 = arith.mulf %167, %171 : vector<1x16x16xf32>
    %173 = arith.truncf %172 : vector<1x16x16xf32> to vector<1x16x16xbf16>
    "tpu.trace_start"() <{level = 10 : i32, message = "bnm,bmd->bnd"}> : () -> ()
    %cst_52 = arith.constant dense<0.000000e+00> : vector<1x16x8xf32>
    %174 = tpu.matmul %173, %159, %cst_52 {dimension_numbers = #tpu.dot_dimension_numbers<[2], [1], [1], [2], [0, 0, 0, 1, 1, 2], [0], [0]>} : vector<1x16x16xbf16>, vector<1x16x8xbf16>, vector<1x16x8xf32> -> vector<1x16x8xf32>
    "tpu.trace_stop"() : () -> ()
    %175 = tpu.concatenate %48, %66, %84, %102, %120, %138, %156, %174 in 2 : vector<1x16x8xf32>, vector<1x16x8xf32>, vector<1x16x8xf32>, vector<1x16x8xf32>, vector<1x16x8xf32>, vector<1x16x8xf32>, vector<1x16x8xf32>, vector<1x16x8xf32> -> vector<1x16x64xf32>
    %176 = vector.shape_cast %175 : vector<1x16x64xf32> to vector<16x64xf32>
    %177 = arith.truncf %176 : vector<16x64xf32> to vector<16x64xbf16>
    %c0_53 = arith.constant 0 : index
    %c0_54 = arith.constant 0 : index
    %178 = vector.load %arg5[%c0_53, %c0_54] : memref<64x64xbf16, #tpu.memory_space<vmem>>, vector<64x64xbf16>
    %cst_55 = arith.constant dense<0.000000e+00> : vector<16x64xf32>
    %179 = tpu.matmul %177, %178, %cst_55 {dimension_numbers = #tpu.dot_dimension_numbers<[1], [0], [0], [1], [0, 0, 1, 1], [], []>} : vector<16x64xbf16>, vector<64x64xbf16>, vector<16x64xf32> -> vector<16x64xf32>
    %c0_56 = arith.constant 0 : index
    %c0_57 = arith.constant 0 : index
    %180 = vector.load %arg6[%c0_56, %c0_57] : memref<1x64xf32, #tpu.memory_space<vmem>>, vector<1x64xf32>
    %181 = vector.broadcast %180 : vector<1x64xf32> to vector<16x64xf32>
    %182 = arith.addf %179, %181 : vector<16x64xf32>
    %183 = arith.addf %1, %182 : vector<16x64xf32>
    %cst_58 = arith.constant dense<0.000000e+00> : vector<16xf32>
    %184 = vector.multi_reduction <add>, %183, %cst_58 [1] : vector<16x64xf32> to vector<16xf32>
    %185 = vector.shape_cast %184 : vector<16xf32> to vector<16x1xf32>
    %cst_59 = arith.constant 6.400000e+01 : f32
    %186 = vector.broadcast %cst_59 : f32 to vector<16x1xf32>
    %187 = arith.divf %185, %186 : vector<16x1xf32>
    %188 = vector.broadcast %187 : vector<16x1xf32> to vector<16x64xf32>
    %189 = arith.subf %183, %188 : vector<16x64xf32>
    %190 = arith.mulf %189, %189 : vector<16x64xf32>
    %cst_60 = arith.constant dense<0.000000e+00> : vector<16xf32>
    %191 = vector.multi_reduction <add>, %190, %cst_60 [1] : vector<16x64xf32> to vector<16xf32>
    %192 = vector.shape_cast %191 : vector<16xf32> to vector<16x1xf32>
    %cst_61 = arith.constant 6.400000e+01 : f32
    %193 = vector.broadcast %cst_61 : f32 to vector<16x1xf32>
    %194 = arith.divf %192, %193 : vector<16x1xf32>
    %195 = vector.broadcast %187 : vector<16x1xf32> to vector<16x64xf32>
    %196 = arith.subf %183, %195 : vector<16x64xf32>
    %cst_62 = arith.constant 9.99999974E-6 : f32
    %197 = vector.broadcast %cst_62 : f32 to vector<16x1xf32>
    %198 = arith.addf %194, %197 : vector<16x1xf32>
    %199 = math.rsqrt %198 : vector<16x1xf32>
    %200 = vector.broadcast %199 : vector<16x1xf32> to vector<16x64xf32>
    %201 = arith.mulf %196, %200 : vector<16x64xf32>
    %c0_63 = arith.constant 0 : index
    %c0_64 = arith.constant 0 : index
    %202 = vector.load %arg7[%c0_63, %c0_64] : memref<1x64xf32, #tpu.memory_space<vmem>>, vector<1x64xf32>
    %203 = vector.broadcast %202 : vector<1x64xf32> to vector<16x64xf32>
    %204 = arith.mulf %201, %203 : vector<16x64xf32>
    %c0_65 = arith.constant 0 : index
    %c0_66 = arith.constant 0 : index
    %205 = vector.load %arg8[%c0_65, %c0_66] : memref<1x64xf32, #tpu.memory_space<vmem>>, vector<1x64xf32>
    %206 = vector.broadcast %205 : vector<1x64xf32> to vector<16x64xf32>
    %207 = arith.addf %204, %206 : vector<16x64xf32>
    %208 = arith.truncf %207 : vector<16x64xf32> to vector<16x64xbf16>
    %c0_67 = arith.constant 0 : index
    %c0_68 = arith.constant 0 : index
    %209 = vector.load %arg9[%c0_67, %c0_68] : memref<64x256xbf16, #tpu.memory_space<vmem>>, vector<64x256xbf16>
    %cst_69 = arith.constant dense<0.000000e+00> : vector<16x256xf32>
    %210 = tpu.matmul %208, %209, %cst_69 {dimension_numbers = #tpu.dot_dimension_numbers<[1], [0], [0], [1], [0, 0, 1, 1], [], []>} : vector<16x64xbf16>, vector<64x256xbf16>, vector<16x256xf32> -> vector<16x256xf32>
    %c0_70 = arith.constant 0 : index
    %c0_71 = arith.constant 0 : index
    %211 = vector.load %arg10[%c0_70, %c0_71] : memref<1x256xf32, #tpu.memory_space<vmem>>, vector<1x256xf32>
    %212 = vector.broadcast %211 : vector<1x256xf32> to vector<16x256xf32>
    %213 = arith.addf %210, %212 : vector<16x256xf32>
    %cst_72 = arith.constant 5.000000e-01 : f32
    %214 = vector.broadcast %cst_72 : f32 to vector<16x256xf32>
    %215 = arith.mulf %214, %213 : vector<16x256xf32>
    %cst_73 = arith.constant 0.707106769 : f32
    %216 = vector.broadcast %cst_73 : f32 to vector<16x256xf32>
    %217 = arith.mulf %213, %216 : vector<16x256xf32>
    %218 = math.erf %217 : vector<16x256xf32>
    %cst_74 = arith.constant 1.000000e+00 : f32
    %219 = vector.broadcast %cst_74 : f32 to vector<16x256xf32>
    %220 = arith.addf %219, %218 : vector<16x256xf32>
    %221 = arith.mulf %215, %220 : vector<16x256xf32>
    %222 = arith.truncf %221 : vector<16x256xf32> to vector<16x256xbf16>
    %c0_75 = arith.constant 0 : index
    %c0_76 = arith.constant 0 : index
    %223 = vector.load %arg11[%c0_75, %c0_76] : memref<256x64xbf16, #tpu.memory_space<vmem>>, vector<256x64xbf16>
    %cst_77 = arith.constant dense<0.000000e+00> : vector<16x64xf32>
    %224 = tpu.matmul %222, %223, %cst_77 {dimension_numbers = #tpu.dot_dimension_numbers<[1], [0], [0], [1], [0, 0, 1, 1], [], []>} : vector<16x256xbf16>, vector<256x64xbf16>, vector<16x64xf32> -> vector<16x64xf32>
    %c0_78 = arith.constant 0 : index
    %c0_79 = arith.constant 0 : index
    %225 = vector.load %arg12[%c0_78, %c0_79] : memref<1x64xf32, #tpu.memory_space<vmem>>, vector<1x64xf32>
    %226 = vector.broadcast %225 : vector<1x64xf32> to vector<16x64xf32>
    %227 = arith.addf %224, %226 : vector<16x64xf32>
    %228 = arith.addf %183, %227 : vector<16x64xf32>
    %229 = vector.shape_cast %228 : vector<16x64xf32> to vector<1x16x64xf32>
    %c0_80 = arith.constant 0 : index
    %c0_81 = arith.constant 0 : index
    %c0_82 = arith.constant 0 : index
    %230 = vector.load %arg13[%c0_80, %c0_81, %c0_82] : memref<1x16x64xf32, #tpu.memory_space<vmem>>, vector<1x16x64xf32>
    tpu.vector_store %arg13[%c0_80, %c0_81, %c0_82], %229 {strides = array<i32>} : memref<1x16x64xf32, #tpu.memory_space<vmem>>, vector<1x16x64xf32>,
    return
  }
  func.func @transform_0(%arg0: i32) -> (i32, i32, i32) {
    %c0_i32 = arith.constant 0 : i32
    %c0_i32_0 = arith.constant 0 : i32
    %c0_i32_1 = arith.constant 0 : i32
    return %arg0, %c0_i32, %c0_i32_0 : i32, i32, i32
  }
  func.func @transform_1(%arg0: i32) -> (i32, i32) {
    %c0_i32 = arith.constant 0 : i32
    %c0_i32_0 = arith.constant 0 : i32
    %c0_i32_1 = arith.constant 0 : i32
    return %c0_i32, %c0_i32_0 : i32, i32
  }
  func.func @transform_2(%arg0: i32) -> (i32, i32) {
    %c0_i32 = arith.constant 0 : i32
    %c0_i32_0 = arith.constant 0 : i32
    %c0_i32_1 = arith.constant 0 : i32
    return %c0_i32, %c0_i32_0 : i32, i32
  }
  func.func @transform_3(%arg0: i32) -> (i32, i32) {
    %c0_i32 = arith.constant 0 : i32
    %c0_i32_0 = arith.constant 0 : i32
    %c0_i32_1 = arith.constant 0 : i32
    return %c0_i32, %c0_i32_0 : i32, i32
  }
  func.func @transform_4(%arg0: i32) -> (i32, i32) {
    %c0_i32 = arith.constant 0 : i32
    %c0_i32_0 = arith.constant 0 : i32
    %c0_i32_1 = arith.constant 0 : i32
    return %c0_i32, %c0_i32_0 : i32, i32
  }
  func.func @transform_5(%arg0: i32) -> (i32, i32) {
    %c0_i32 = arith.constant 0 : i32
    %c0_i32_0 = arith.constant 0 : i32
    %c0_i32_1 = arith.constant 0 : i32
    return %c0_i32, %c0_i32_0 : i32, i32
  }
  func.func @transform_6(%arg0: i32) -> (i32, i32) {
    %c0_i32 = arith.constant 0 : i32
    %c0_i32_0 = arith.constant 0 : i32
    %c0_i32_1 = arith.constant 0 : i32
    return %c0_i32, %c0_i32_0 : i32, i32
  }
  func.func @transform_7(%arg0: i32) -> (i32, i32) {
    %c0_i32 = arith.constant 0 : i32
    %c0_i32_0 = arith.constant 0 : i32
    %c0_i32_1 = arith.constant 0 : i32
    return %c0_i32, %c0_i32_0 : i32, i32
  }
  func.func @transform_8(%arg0: i32) -> (i32, i32) {
    %c0_i32 = arith.constant 0 : i32
    %c0_i32_0 = arith.constant 0 : i32
    %c0_i32_1 = arith.constant 0 : i32
    return %c0_i32, %c0_i32_0 : i32, i32
  }
  func.func @transform_9(%arg0: i32) -> (i32, i32) {
    %c0_i32 = arith.constant 0 : i32
    %c0_i32_0 = arith.constant 0 : i32
    %c0_i32_1 = arith.constant 0 : i32
    return %c0_i32, %c0_i32_0 : i32, i32
  }
  func.func @transform_10(%arg0: i32) -> (i32, i32) {
    %c0_i32 = arith.constant 0 : i32
    %c0_i32_0 = arith.constant 0 : i32
    %c0_i32_1 = arith.constant 0 : i32
    return %c0_i32, %c0_i32_0 : i32, i32
  }
  func.func @transform_11(%arg0: i32) -> (i32, i32) {
    %c0_i32 = arith.constant 0 : i32
    %c0_i32_0 = arith.constant 0 : i32
    %c0_i32_1 = arith.constant 0 : i32
    return %c0_i32, %c0_i32_0 : i32, i32
  }
  func.func @transform_12(%arg0: i32) -> (i32, i32, i32) {
    %c0_i32 = arith.constant 0 : i32
    %c0_i32_0 = arith.constant 0 : i32
    %c0_i32_1 = arith.constant 0 : i32
    return %arg0, %c0_i32, %c0_i32_0 : i32, i32, i32
  }
}

</mosaic_0001>

<bundles_post_ra>
// kernel: tpu_custom_call.1
= control target key start
LH: loop header
LB: loop body
LE: loop exit
PB: predicated region body
PF: predicated region fallthrough
CT: control target
= control target key end

     0   :  { %s3300_s0 = inlined_call_operand.vmem [shape: f32[2,16,64], index: 0, kind: input, shape index: {}]   ;;  %s3301_s1 = inlined_call_operand.vmem [shape: f32[1,64], index: 1, kind: input, shape index: {}]   ;;  %s3302_s2 = inlined_call_operand.vmem [shape: f32[1,64], index: 2, kind: input, shape index: {}]   ;;  %s3303_s3 = inlined_call_operand.vmem [shape: bf16[64,192], index: 3, kind: input, shape index: {}]   ;;  %s3304_s4 = inlined_call_operand.vmem [shape: bf16[64,64], index: 4, kind: input, shape index: {}]   ;;  %s3305_s5 = inlined_call_operand.vmem [shape: f32[1,64], index: 5, kind: input, shape index: {}]   ;;  %s3306_s6 = inlined_call_operand.vmem [shape: f32[1,64], index: 6, kind: input, shape index: {}]   ;;  %s3307_s7 = inlined_call_operand.vmem [shape: f32[1,64], index: 7, kind: input, shape index: {}]   ;;  %s3308_s8 = inlined_call_operand.vmem [shape: bf16[64,256], index: 8, kind: input, shape index: {}]   ;;  %s3309_s9 = inlined_call_operand.vmem [shape: f32[1,256], index: 9, kind: input, shape index: {}]   ;;  %s3310_s10 = inlined_call_operand.vmem [shape: bf16[256,64], index: 10, kind: input, shape index: {}]   ;;  %s3311_s11 = inlined_call_operand.vmem [shape: f32[1,64], index: 11, kind: input, shape index: {}]   ;;  %s3312_s12 = inlined_call_operand.hbm [shape: f32[2,16,64], index: 12, kind: output, shape index: {}]  }
   0x1   :  { %3317 = sst [smem:[#allocation6_spill]] %s3300_s0 }
   0x2   :  { %17 = vsyncpa [#allocation3], 0 }
   0x3   :  { %19 = vsyncpa [#allocation3 + $0x1], 0  ;;  %s2741_s21 = smov 0   ;;  %s2743_s22 = smov 0  }
   0x4   :  { %s2745_s23 = smov 0   ;;  %s2747_s24 = smov 0  }
   0x5 LB: > { %s2762_s25 = sadd.s32 4294967295, %s2654_s24   ;;  %s2131_s26 = sadd.s32 4294967294, %s2654_s24   ;;  %s2654_s24 = sphi %s2747_s24, %s3330_s24   ;;  %s2650_s23 = sphi %s2745_s23, %s3329_s23   ;;  %s2646_s22 = sphi %s2743_s22, %s3328_s22   ;;  %s2642_s21 = sphi %s2741_s21, %s3327_s21  }
   0x6   : > { %s2766_s27 = sadd.s32 1, %s2654_s24   ;;  %s289_s28 = sadd.s32 1, %s2650_s23 }
   0x7   : > { %s286_s29 = ssub.s32 %s2654_s24, %s2766_s27  ;;  %p299_p0 = scmp.ne.s32.totalorder %s2650_s23, %s2646_s22 }
   0x8   : > { %p287_p1 = scmp.eq.s32.totalorder %s286_s29, 0  ;;  %p300_p2 = scmp.eq.s32.totalorder %s2762_s25, 1 }
   0x9   : > { %p305_p3 = scmp.ne.s32.totalorder %s2646_s22, %s2642_s21  ;;  %p306_p4 = scmp.eq.s32.totalorder %s2131_s26, 1 }
   0xa   : > { %s2777_s30 = scalar_select %p287_p1, %s2650_s23, %s289_s28  }
   0xb   : > { %p2779_p5 = por %p300_p2, %p299_p0  ;;  %p2783_p6 = por %p306_p4, %p305_p3 }
   0xc   : > { %3318 = sst [smem:[#allocation5_spill]] %s2777_s30  ;;  %p2134_p7 = scmp.ge.s32.totalorder %s2654_s24, 1 }
   0xd   : > { %p365_p8 = scmp.lt.s32.totalorder %s2654_s24, 3 }
   0xf   : > { %p366_p9 = pnand %p2134_p7, %p365_p8 }
  0x10   : > { %p407_p10 = scmp.lt.s32.totalorder (!%p366_p9), %s2762_s25, 1  ;;  %vm415_vm0 = vcmask (!%p366_p9), 523264   ;;  %s3321_s0 = sld [smem:[#allocation6_spill]] (!%p366_p9)  ;;  %v2466_v14 = vld [vmem:[%s3303_s3 + $0x4] ss:$8 sps:$4 sm:$0xff] (!%p366_p9)   ;;  %v2656_v22 = vmov (!%p366_p9), 0  }
  0x11   : > { %369 = sbr.rel (%p366_p9) target bundleno = 2683 (0xa7b), region = 68  ;;  %v2468_v15 = vld [vmem:[%s3303_s3] ss:$8 sps:$4 sm:$0xff] (!%p366_p9)   ;;  %513 = vmatprep.subr.bf16.mxu1 (!%p366_p9), %v2466_v14  ;;  %v2469_v16 = vld [vmem:[%s3303_s3 + $0x14] ss:$8 sps:$4 sm:$0xff] (!%p366_p9)   ;;  %545 = vmatprep.mubr.bf16.mxu1 (!%p366_p9), %v2656_v22  ;;  %v2657_v40 = vmov (!%p366_p9), 0.0  }
  0x12   : > { %514 = vmatpush1.bf16.msra.mxu1 (!%p366_p9), %v2468_v15  ;;  %v2471_v17 = vld [vmem:[%s3303_s3 + $0x10] ss:$8 sps:$4 sm:$0xff] (!%p366_p9)   ;;  %v2472_v18 = vld [vmem:[%s3303_s3 + $0x24] ss:$8 sps:$4 sm:$0xff] (!%p366_p9)   ;;  %v2474_v19 = vld [vmem:[%s3303_s3 + $0x20] ss:$8 sps:$4 sm:$0xff] (!%p366_p9)   ;;  %2277 = vmatprep.subr.bf16.mxu0 (!%p366_p9), %v2657_v40 }
  0x13   : > { %515 = vmatprep.subr.bf16.mxu1 (!%p366_p9), %v2469_v16  ;;  %v2475_v20 = vld [vmem:[%s3303_s3 + $0x34] ss:$8 sps:$4 sm:$0xff] (!%p366_p9)   ;;  %v2477_v21 = vld [vmem:[%s3303_s3 + $0x30] ss:$8 sps:$4 sm:$0xff] (!%p366_p9)   ;;  %v2138_v31 = vld [vmem:[%s3301_s1] ss:$0 sm:$0xff] (!%p366_p9) }
  0x14   : > { %v2139_v35 = vld [vmem:[%s3302_s2] ss:$0 sm:$0xff] (!%p366_p9)  ;;  %vm2658_vm1 = vmmov (!%p366_p9), 0   ;;  %s3313_s20 = smov (!%p366_p9), 56   ;;  %s2660_s26 = smov (!%p366_p9), 64   ;;  %vm561_vm2 = vcmask (!%p366_p9), 64512  }
  0x15   : > { %2279 = vmatprep.mubr.msk.bf16.mxu0 (!%p366_p9), %vm2658_vm1, %v2657_v40  ;;  %s2661_s28 = smov (!%p366_p9), 120   ;;  %s2662_s29 = smov (!%p366_p9), 112   ;;  %vm611_vm3 = vcmask (!%p366_p9), 130048   ;;  %vm1601_vm4 = vcmask (!%p366_p9), 195584   ;;  %vm1604_vm5 = vcmask (!%p366_p9), 261120   ;;  %vm1607_vm6 = vcmask (!%p366_p9), 326656  }
  0x16   : > { %516 = vmatpush1.bf16.msra.mxu1 (!%p366_p9), %v2471_v17  ;;  %s2666_s30 = smov (!%p366_p9), 96   ;;  %s2667_s17 = smov (!%p366_p9), 32   ;;  %vm1610_vm7 = vcmask (!%p366_p9), 392192   ;;  %vm1613_vm8 = vcmask (!%p366_p9), 457728  }
  0x17   : > { %517 = vmatprep.subr.bf16.mxu1 (!%p366_p9), %v2472_v18  ;;  %s2668_s18 = smov (!%p366_p9), 88  }
  0x18   : > { %s408_s15 = scalar_select %p407_p10, %s2762_s25, 1 }
  0x1a   : > { %s2204_s16 = sshll.u32 %s408_s15, 4  ;;  %518 = vmatpush1.bf16.msra.mxu1 %v2474_v19  ;;  %s3314_s15 = smov 48  }
  0x1b   : > { %s2794_s19 = scalar_lea.vmem %s3321_s0, %s2204_s16  ;;  %519 = vmatprep.subr.bf16.mxu1 %v2475_v20  ;;  %s3315_s16 = smov 104  }
  0x1c   : > { %v413_v0 = vld [vmem:[%s2794_s19] sm:$0xff]  ;;  %v414_v1 = vld [vmem:[%s2794_s19 + $0x8] sm:$0xff]  ;;  %s3316_s0 = smov 40  }
  0x1d   : > { %v416_v2 = vsel %vm415_vm0, %v413_v0, 0.0  ;;  %v419_v3 = vsel %vm415_vm0, %v414_v1, 0.0 }
  0x1e   : > { %417 = vadd.xlane.f32.xlu0 %v416_v2  ;;  %520 = vmatpush1.bf16.msra.mxu1 %v2477_v21 }
  0x1f   : > { %2265 = vmatprep.subr.bf16.mxu1 %v2657_v40 }
  0x22   : > { %420 = vadd.xlane.f32.xlu0 %v419_v3 }
  0xab   : > { %v418_v4 = vpop.xlane.xlu0 %417 }
  0xac   : > { %v423_v5 = vmul.f32 0.015625, %v418_v4 }
  0xae   : > { %v425_v6 = vsub.f32 %v413_v0, %v423_v5 }
  0xaf   : > { %v421_v7 = vpop.xlane.xlu0 %420 }
  0xb0   : > { %v424_v8 = vmul.f32 0.015625, %v421_v7  ;;  %v427_v9 = vmul.f32 %v425_v6, %v425_v6 }
  0xb2   : > { %v426_v10 = vsub.f32 %v414_v1, %v424_v8  ;;  %v429_v11 = vsel %vm415_vm0, %v427_v9, 0.0 }
  0xb3   : > { %430 = vadd.xlane.f32.xlu1 %v429_v11 }
  0xb4   : > { %v428_v12 = vmul.f32 %v426_v10, %v426_v10 }
  0xb6   : > { %v432_v13 = vsel %vm415_vm0, %v428_v12, 0.0 }
  0xb7   : > { %433 = vadd.xlane.f32.xlu1 %v432_v13 }
 0x140   : > { %v431_v23 = vpop.xlane.xlu1 %430 }
 0x141   : > { %v435_v24 = vmul.f32 0.015625, %v431_v23 }
 0x143   : > { %v437_v25 = vadd.f32 1e-05, %v435_v24 }
 0x144   : > { %v434_v26 = vpop.xlane.xlu1 %433 }
 0x145   : > { %2510 = vrsqrt.f32 %v437_v25  ;;  %v436_v27 = vmul.f32 0.015625, %v434_v26 }
 0x147   : > { %v438_v28 = vadd.f32 1e-05, %v436_v27 }
 0x149   : > { %2512 = vrsqrt.f32 %v438_v28 }
 0x14f   : > { %v2511_v29 = vpop.eup %2510 }
 0x150   : > { %v441_v30 = vmul.f32 %v2511_v29, %v425_v6 }
 0x152   : > { %v450_v34 = vmul.f32 %v2138_v31, %v441_v30 }
 0x153   : > { %v2513_v32 = vpop.eup %2512 }
 0x154   : > { %v442_v33 = vmul.f32 %v2513_v32, %v426_v10  ;;  %v459_v37 = vadd.f32 %v2139_v35, %v450_v34 }
 0x156   : > { %v451_v36 = vmul.f32 %v2138_v31, %v442_v33 }
 0x158   : > { %v460_v38 = vadd.f32 %v2139_v35, %v451_v36 }
 0x15a   : > { %v461_v39 = vpack.c.bf16 %v460_v38, %v459_v37 }
 0x15c   : > { %2148 = vmatmul.mubr.msk.bf16.vlgmr.msra.gmra.mrb[0].mxu1 %vm415_vm0, %v461_v39 }
 0x15d   : > { %2267 = vmatprep.mubr.msk.bf16.mxu1 %vm2658_vm1, %v2657_v40 }
 0x22f   : > { %v547_v41 = vpop.f32.mrb[0].mxu1 }
 0x230   : > { %v549_v42 = vpop.f32.mrb[1].mxu1 }
 0x231   : > { %v551_v43 = vpop.f32.mrb[2].mxu1 }
 0x232   : > { %v556_v44 = vpack.c.bf16 %v551_v43, %v547_v41  ;;  %v553_v45 = vpop.f32.mrb[3].mxu1 }
 0x233   : > { %v2840_v46 = vpack.c.bf16 %v553_v45, %v549_v42 }
 0x234   : > { %681 = vrot.lane.b32.xlu1 %v556_v44, %s3313_s20  ;;  %559 = vrot.lane.b32.xlu0 %v556_v44, %s2660_s26  ;;  %s2669_s26 = smov 24   ;;  %s2670_s20 = smov 80  }
 0x238   : > { %679 = vrot.lane.b32.xlu1 %v556_v44, %s2661_s28  ;;  %803 = vrot.lane.b32.xlu0 %v556_v44, %s2662_s29 }
 0x23c   : > { %805 = vrot.lane.b32.xlu1 %v556_v44, %s3314_s15  ;;  %926 = vrot.lane.b32.xlu0 %v556_v44, %s3315_s16  ;;  %s2671_s15 = smov 16   ;;  %s2672_s16 = smov 72  }
 0x240   : > { %928 = vrot.lane.b32.xlu1 %v556_v44, %s3316_s0  ;;  %1049 = vrot.lane.b32.xlu0 %v556_v44, %s2666_s30  ;;  %s2673_s0 = smov 8  }
 0x244   : > { %1051 = vrot.lane.b32.xlu1 %v556_v44, %s2667_s17  ;;  %1172 = vrot.lane.b32.xlu0 %v556_v44, %s2668_s18 }
 0x248   : > { %1174 = vrot.lane.b32.xlu1 %v556_v44, %s2669_s26  ;;  %1295 = vrot.lane.b32.xlu0 %v556_v44, %s2670_s20 }
 0x24c   : > { %1297 = vrot.lane.b32.xlu1 %v556_v44, %s2671_s15  ;;  %1418 = vrot.lane.b32.xlu0 %v556_v44, %s2672_s16 }
 0x250   : > { %1420 = vrot.lane.b32.xlu1 %v556_v44, %s2673_s0 }
 0x2a6   : > { %v682_v47 = vpop.permute.xlu1 %681  ;;  %v560_v48 = vpop.permute.xlu0 %559 }
 0x2a7   : > { %v566_v49 = vsel %vm561_vm2, %v560_v48, 0  ;;  %v687_v50 = vsel %vm561_vm2, %v682_v47, 0 }
 0x2a8   : > { %2266 = vmatpush3.bf16.xpose.msra.mxu1 %v566_v49  ;;  %2278 = vmatpush3.bf16.xpose.msra.mxu0 %v687_v50 }
 0x2a9   : > { %2271 = vmatprep.subr.bf16.mxu1 %v2657_v40  ;;  %2289 = vmatprep.subr.bf16.mxu0 %v2657_v40 }
 0x2aa   : > { %v680_v51 = vpop.permute.xlu1 %679  ;;  %v804_v55 = vpop.permute.xlu0 %803 }
 0x2ae   : > { %v806_v52 = vpop.permute.xlu1 %805  ;;  %v927_v58 = vpop.permute.xlu0 %926 }
 0x2af   : > { %v811_v53 = vsel %vm561_vm2, %v806_v52, 0  ;;  %2268 = vmatmul.mubr.msk.bf16.vlgmr.msra.gmra.mrb[4].mxu1 %vm561_vm2, %v556_v44  ;;  %2280 = vmatmul.mubr.msk.bf16.vlgmr.msra.gmra.mrb[0].mxu0 %vm561_vm2, %v680_v51 }
 0x2b0   : > { %2272 = vmatpush3.bf16.msra.mxu1 %v2840_v46  ;;  %2290 = vmatpush3.bf16.xpose.msra.mxu0 %v811_v53 }
 0x2b1   : > { %2291 = vmatprep.mubr.msk.bf16.mxu0 %vm2658_vm1, %v2657_v40  ;;  %2301 = vmatprep.subr.bf16.mxu0 %v2657_v40 }
 0x2b2   : > { %2273 = vmatprep.mubr.msk.bf16.mxu1 %vm2658_vm1, %v2657_v40  ;;  %2283 = vmatprep.subr.bf16.mxu1 %v2657_v40  ;;  %v929_v54 = vpop.permute.xlu1 %928  ;;  %v1050_v61 = vpop.permute.xlu0 %1049 }
 0x2b3   : > { %v934_v56 = vsel %vm561_vm2, %v929_v54, 0 }
 0x2b6   : > { %v1052_v57 = vpop.permute.xlu1 %1051  ;;  %v1173_v0 = vpop.permute.xlu0 %1172 }
 0x2b7   : > { %2292 = vmatmul.mubr.msk.bf16.vlgmr.msra.gmra.mrb[4].mxu0 %vm561_vm2, %v804_v55  ;;  %v1057_v59 = vsel %vm561_vm2, %v1052_v57, 0 }
 0x2b8   : > { %2302 = vmatpush3.bf16.xpose.msra.mxu0 %v934_v56  ;;  %2303 = vmatprep.mubr.msk.bf16.mxu0 %vm2658_vm1, %v2657_v40 }
 0x2b9   : > { %2313 = vmatprep.subr.bf16.mxu0 %v2657_v40 }
 0x2ba   : > { %v1175_v60 = vpop.permute.xlu1 %1174  ;;  %v1296_v3 = vpop.permute.xlu0 %1295 }
 0x2bb   : > { %v1180_v62 = vsel %vm561_vm2, %v1175_v60, 0 }
 0x2be   : > { %v1298_v63 = vpop.permute.xlu1 %1297  ;;  %v1419_v5 = vpop.permute.xlu0 %1418 }
 0x2bf   : > { %2304 = vmatmul.mubr.msk.bf16.vlgmr.msra.gmra.mrb[8].mxu0 %vm561_vm2, %v927_v58  ;;  %v1303_v1 = vsel %vm561_vm2, %v1298_v63, 0 }
 0x2c0   : > { %2314 = vmatpush3.bf16.xpose.msra.mxu0 %v1057_v59  ;;  %2315 = vmatprep.mubr.msk.bf16.mxu0 %vm2658_vm1, %v2657_v40 }
 0x2c1   : > { %2325 = vmatprep.subr.bf16.mxu0 %v2657_v40 }
 0x2c2   : > { %v1421_v2 = vpop.permute.xlu1 %1420 }
 0x2c3   : > { %v1426_v4 = vsel %vm561_vm2, %v1421_v2, 0 }
 0x2c7   : > { %2316 = vmatmul.mubr.msk.bf16.vlgmr.msra.gmra.mrb[12].mxu0 %vm561_vm2, %v1050_v61 }
 0x2c8   : > { %2326 = vmatpush3.bf16.xpose.msra.mxu0 %v1180_v62  ;;  %2327 = vmatprep.mubr.msk.bf16.mxu0 %vm2658_vm1, %v2657_v40 }
 0x2c9   : > { %2337 = vmatprep.subr.bf16.mxu0 %v2657_v40 }
 0x2cf   : > { %2328 = vmatmul.mubr.msk.bf16.vlgmr.msra.gmra.mrb[16].mxu0 %vm561_vm2, %v1173_v0 }
 0x2d0   : > { %2338 = vmatpush3.bf16.xpose.msra.mxu0 %v1303_v1  ;;  %2339 = vmatprep.mubr.msk.bf16.mxu0 %vm2658_vm1, %v2657_v40 }
 0x2d1   : > { %2349 = vmatprep.subr.bf16.mxu0 %v2657_v40 }
 0x2d7   : > { %2340 = vmatmul.mubr.msk.bf16.vlgmr.msra.gmra.mrb[20].mxu0 %vm561_vm2, %v1296_v3 }
 0x2d8   : > { %2350 = vmatpush3.bf16.xpose.msra.mxu0 %v1426_v4  ;;  %2351 = vmatprep.mubr.msk.bf16.mxu0 %vm2658_vm1, %v2657_v40 }
 0x2d9   : > { %2361 = vmatprep.subr.bf16.mxu0 %v2657_v40 }
 0x2df   : > { %2352 = vmatmul.mubr.msk.bf16.vlgmr.msra.gmra.mrb[24].mxu0 %vm561_vm2, %v1419_v5 }
 0x2e0   : > { %2369 = vmatprep.mubr.msk.bf16.mxu0 %vm2658_vm1, %v2657_v40 }
 0x382   : > { %v602_v6 = vpop.f32.mrb[4].mxu1  ;;  %v723_v7 = vpop.f32.mrb[0].mxu0 }
 0x383   : > { %v2898_v8 = vmul.f32 0.35355338, %v602_v6  ;;  %v2269_v9 = vpop.f32.mrb[5].mxu1  ;;  %v2281_v10 = vpop.f32.mrb[1].mxu0  ;;  %v2904_v17 = vmul.f32 0.35355338, %v723_v7 }
 0x384   : > { %v605_v11 = vpop.f32.mrb[6].mxu1  ;;  %v726_v12 = vpop.f32.mrb[2].mxu0 }
 0x385   : > { %v2900_v13 = vmul.f32 0.35355338, %v605_v11  ;;  %v2270_v14 = vpop.f32.mrb[7].mxu1  ;;  %v2282_v15 = vpop.f32.mrb[3].mxu0  ;;  %v612_v16 = vsel %vm611_vm3, %v2898_v8, -inf  ;;  %v732_v23 = vsel %vm611_vm3, %v2904_v17, -inf }
 0x386   : > { %613 = vmax.xlane.f32.xlu1 %v612_v16  ;;  %v2908_v20 = vmul.f32 0.35355338, %v726_v12 }
 0x387   : > { %v615_v18 = vsel %vm611_vm3, %v2900_v13, -inf }
 0x388   : > { %616 = vmax.xlane.f32.xlu0 %v615_v18  ;;  %v735_v27 = vsel %vm611_vm3, %v2908_v20, -inf }
 0x38a   : > { %v847_v19 = vpop.f32.mrb[4].mxu0 }
 0x38b   : > { %v2293_v21 = vpop.f32.mrb[5].mxu0  ;;  %v2938_v60 = vmul.f32 0.35355338, %v847_v19 }
 0x38c   : > { %v850_v24 = vpop.f32.mrb[6].mxu0  ;;  %733 = vmax.xlane.f32.xlu0 %v732_v23 }
 0x38d   : > { %v2294_v25 = vpop.f32.mrb[7].mxu0  ;;  %v2912_v26 = vmul.f32 0.35355338, %v850_v24  ;;  %v856_v63 = vsel %vm611_vm3, %v2938_v60, -inf }
 0x38f   : > { %v859_v30 = vsel %vm611_vm3, %v2912_v26, -inf }
 0x390   : > { %736 = vmax.xlane.f32.xlu0 %v735_v27 }
 0x392   : > { %v970_v28 = vpop.f32.mrb[8].mxu0 }
 0x393   : > { %v2305_v29 = vpop.f32.mrb[9].mxu0  ;;  %v2942_v62 = vmul.f32 0.35355338, %v970_v28 }
 0x394   : > { %v973_v31 = vpop.f32.mrb[10].mxu0  ;;  %860 = vmax.xlane.f32.xlu0 %v859_v30 }
 0x395   : > { %v2918_v32 = vmul.f32 0.35355338, %v973_v31  ;;  %v2306_v33 = vpop.f32.mrb[11].mxu0  ;;  %v979_v1 = vsel %vm611_vm3, %v2942_v62, -inf }
 0x397   : > { %v982_v34 = vsel %vm611_vm3, %v2918_v32, -inf  ;;  %756 = vrot.lane.b32.xlu1 %v2840_v46, %s2661_s28  ;;  %s3322_s28 = smov 104  }
 0x398   : > { %983 = vmax.xlane.f32.xlu0 %v982_v34 }
 0x39a   : > { %v1093_v35 = vpop.f32.mrb[12].mxu0 }
 0x39b   : > { %v2317_v36 = vpop.f32.mrb[13].mxu0  ;;  %v2946_v0 = vmul.f32 0.35355338, %v1093_v35 }
 0x39c   : > { %v1096_v37 = vpop.f32.mrb[14].mxu0 }
 0x39d   : > { %v2924_v38 = vmul.f32 0.35355338, %v1096_v37  ;;  %v2318_v39 = vpop.f32.mrb[15].mxu0  ;;  %v1102_v3 = vsel %vm611_vm3, %v2946_v0, -inf }
 0x39f   : > { %v1105_v41 = vsel %vm611_vm3, %v2924_v38, -inf }
 0x3a0   : > { %1106 = vmax.xlane.f32.xlu0 %v1105_v41 }
 0x3a2   : > { %v1216_v42 = vpop.f32.mrb[16].mxu0 }
 0x3a3   : > { %v2329_v43 = vpop.f32.mrb[17].mxu0  ;;  %v2950_v2 = vmul.f32 0.35355338, %v1216_v42 }
 0x3a4   : > { %v1219_v44 = vpop.f32.mrb[18].mxu0 }
 0x3a5   : > { %v2928_v45 = vmul.f32 0.35355338, %v1219_v44  ;;  %v2330_v47 = vpop.f32.mrb[19].mxu0  ;;  %v1225_v5 = vsel %vm611_vm3, %v2950_v2, -inf }
 0x3a7   : > { %v1228_v48 = vsel %vm611_vm3, %v2928_v45, -inf }
 0x3a8   : > { %1229 = vmax.xlane.f32.xlu0 %v1228_v48 }
 0x3aa   : > { %v1339_v49 = vpop.f32.mrb[20].mxu0 }
 0x3ab   : > { %v2341_v50 = vpop.f32.mrb[21].mxu0  ;;  %v2954_v4 = vmul.f32 0.35355338, %v1339_v49 }
 0x3ac   : > { %v1342_v51 = vpop.f32.mrb[22].mxu0 }
 0x3ad   : > { %v2932_v52 = vmul.f32 0.35355338, %v1342_v51  ;;  %v2342_v53 = vpop.f32.mrb[23].mxu0  ;;  %v1348_v7 = vsel %vm611_vm3, %v2954_v4, -inf }
 0x3af   : > { %v1351_v54 = vsel %vm611_vm3, %v2932_v52, -inf }
 0x3b0   : > { %1352 = vmax.xlane.f32.xlu0 %v1351_v54 }
 0x3b2   : > { %v1462_v55 = vpop.f32.mrb[24].mxu0 }
 0x3b3   : > { %v2353_v56 = vpop.f32.mrb[25].mxu0  ;;  %v2958_v6 = vmul.f32 0.35355338, %v1462_v55 }
 0x3b4   : > { %v1465_v57 = vpop.f32.mrb[26].mxu0 }
 0x3b5   : > { %v2936_v58 = vmul.f32 0.35355338, %v1465_v57  ;;  %v2354_v59 = vpop.f32.mrb[27].mxu0  ;;  %v1471_v9 = vsel %vm611_vm3, %v2958_v6, -inf }
 0x3b7   : > { %v1474_v61 = vsel %vm611_vm3, %v2936_v58, -inf }
 0x3b8   : > { %1475 = vmax.xlane.f32.xlu0 %v1474_v61 }
 0x3bb   : > { %857 = vmax.xlane.f32.xlu1 %v856_v63 }
 0x3bf   : > { %980 = vmax.xlane.f32.xlu1 %v979_v1 }
 0x3c3   : > { %1103 = vmax.xlane.f32.xlu1 %v1102_v3 }
 0x3c7   : > { %1226 = vmax.xlane.f32.xlu1 %v1225_v5 }
 0x3cb   : > { %1349 = vmax.xlane.f32.xlu1 %v1348_v7 }
 0x3ce   : > { %879 = vrot.lane.b32.xlu0 %v2840_v46, %s2662_s29  ;;  %s3325_s29 = smov 56  }
 0x3cf   : > { %1472 = vmax.xlane.f32.xlu1 %v1471_v9 }
 0x3e0   : > { %1002 = vrot.lane.b32.xlu1 %v2840_v46, %s3322_s28 }
 0x413   : > { %v614_v10 = vpop.xlane.xlu1 %613 }
 0x414   : > { %v618_v11 = vsub.f32 %v2898_v8, %v614_v10 }
 0x415   : > { %v617_v12 = vpop.xlane.xlu0 %616 }
 0x416   : > { %v619_v14 = vsub.f32 %v2900_v13, %v617_v12  ;;  %v620_v15 = vmul.f32 1.442695, %v618_v11 }
 0x417   : > { %v3003_v48 = vpop.permute.xlu1 %756 }
 0x418   : > { %v622_v16 = vmul.f32 1.442695, %v619_v14  ;;  %2514 = vpow2.f32 %v620_v15 }
 0x419   : > { %v734_v18 = vpop.xlane.xlu0 %733 }
 0x41a   : > { %2516 = vpow2.f32 %v622_v16  ;;  %v738_v19 = vsub.f32 %v2904_v17, %v734_v18 }
 0x41c   : > { %v740_v21 = vmul.f32 1.442695, %v738_v19 }
 0x41d   : > { %v737_v23 = vpop.xlane.xlu0 %736 }
 0x41e   : > { %2518 = vpow2.f32 %v740_v21  ;;  %v739_v24 = vsub.f32 %v2908_v20, %v737_v23 }
 0x420   : > { %v742_v25 = vmul.f32 1.442695, %v739_v24 }
 0x421   : > { %v861_v27 = vpop.xlane.xlu0 %860 }
 0x422   : > { %2520 = vpow2.f32 %v742_v25  ;;  %v863_v8 = vsub.f32 %v2912_v26, %v861_v27  ;;  %v2973_v28 = vpop.eup %2514 }
 0x423   : > { %v624_v30 = vsel %vm611_vm3, %v2973_v28, 0.0 }
 0x424   : > { %v2975_v13 = vpop.eup %2516  ;;  %v866_v29 = vmul.f32 1.442695, %v863_v8  ;;  %625 = vadd.xlane.f32.xlu1 %v624_v30 }
 0x425   : > { %v984_v17 = vpop.xlane.xlu0 %983  ;;  %v627_v31 = vsel %vm611_vm3, %v2975_v13, 0.0 }
 0x426   : > { %2522 = vpow2.f32 %v866_v29  ;;  %v986_v20 = vsub.f32 %v2918_v32, %v984_v17  ;;  %628 = vadd.xlane.f32.xlu0 %v627_v31 }
 0x428   : > { %v2982_v33 = vpop.eup %2518  ;;  %v989_v26 = vmul.f32 1.442695, %v986_v20 }
 0x429   : > { %v744_v34 = vsel %vm611_vm3, %v2982_v33, 0.0 }
 0x42a   : > { %2524 = vpow2.f32 %v989_v26  ;;  %745 = vadd.xlane.f32.xlu1 %v744_v34 }
 0x42c   : > { %v2986_v35 = vpop.eup %2520 }
 0x42d   : > { %v1107_v36 = vpop.xlane.xlu0 %1106  ;;  %v747_v37 = vsel %vm611_vm3, %v2986_v35, 0.0 }
 0x42e   : > { %v1109_v39 = vsub.f32 %v2924_v38, %v1107_v36  ;;  %748 = vadd.xlane.f32.xlu0 %v747_v37 }
 0x430   : > { %v2991_v41 = vpop.eup %2522  ;;  %v1112_v32 = vmul.f32 1.442695, %v1109_v39 }
 0x431   : > { %v871_v42 = vsel %vm611_vm3, %v2991_v41, 0.0 }
 0x432   : > { %2526 = vpow2.f32 %v1112_v32  ;;  %872 = vadd.xlane.f32.xlu0 %v871_v42 }
 0x434   : > { %v2995_v43 = vpop.eup %2524 }
 0x435   : > { %v994_v44 = vsel %vm611_vm3, %v2995_v43, 0.0  ;;  %v1230_v56 = vpop.xlane.xlu0 %1229 }
 0x436   : > { %995 = vadd.xlane.f32.xlu0 %v994_v44  ;;  %v1232_v61 = vsub.f32 %v2928_v45, %v1230_v56 }
 0x438   : > { %v1235_v7 = vmul.f32 1.442695, %v1232_v61 }
 0x43c   : > { %v2999_v47 = vpop.eup %2526 }
 0x43d   : > { %v1117_v38 = vsel %vm611_vm3, %v2999_v47, 0.0  ;;  %v1353_v1 = vpop.xlane.xlu0 %1352 }
 0x43e   : > { %1118 = vadd.xlane.f32.xlu0 %v1117_v38  ;;  %v1355_v9 = vsub.f32 %v2932_v52, %v1353_v1 }
 0x440   : > { %v1358_v45 = vmul.f32 1.442695, %v1355_v9 }
 0x445   : > { %v1476_v12 = vpop.xlane.xlu0 %1475 }
 0x446   : > { %v1478_v16 = vsub.f32 %v2936_v58, %v1476_v12 }
 0x448   : > { %v858_v49 = vpop.xlane.xlu1 %857  ;;  %v1481_v23 = vmul.f32 1.442695, %v1478_v16 }
 0x449   : > { %v862_v50 = vsub.f32 %v2938_v60, %v858_v49  ;;  %v880_v37 = vpop.permute.xlu0 %879 }
 0x44b   : > { %v864_v51 = vmul.f32 1.442695, %v862_v50 }
 0x44c   : > { %v981_v53 = vpop.xlane.xlu1 %980 }
 0x44d   : > { %2528 = vpow2.f32 %v864_v51  ;;  %v985_v54 = vsub.f32 %v2942_v62, %v981_v53 }
 0x44f   : > { %v987_v55 = vmul.f32 1.442695, %v985_v54 }
 0x450   : > { %v1104_v57 = vpop.xlane.xlu1 %1103 }
 0x451   : > { %2530 = vpow2.f32 %v987_v55  ;;  %v1108_v59 = vsub.f32 %v2946_v0, %v1104_v57 }
 0x453   : > { %v1110_v63 = vmul.f32 1.442695, %v1108_v59 }
 0x454   : > { %v1227_v3 = vpop.xlane.xlu1 %1226 }
 0x455   : > { %2532 = vpow2.f32 %v1110_v63  ;;  %v1231_v5 = vsub.f32 %v2950_v2, %v1227_v3 }
 0x457   : > { %v3010_v60 = vpop.eup %2528  ;;  %v1233_v62 = vmul.f32 1.442695, %v1231_v5 }
 0x458   : > { %v1350_v10 = vpop.xlane.xlu1 %1349  ;;  %v868_v11 = vsel %vm611_vm3, %v3010_v60, 0.0 }
 0x459   : > { %2534 = vpow2.f32 %v1233_v62  ;;  %869 = vadd.xlane.f32.xlu1 %v868_v11  ;;  %v1354_v31 = vsub.f32 %v2954_v4, %v1350_v10 }
 0x45a   : > { %2536 = vpow2.f32 %v1235_v7 }
 0x45b   : > { %v3015_v0 = vpop.eup %2530  ;;  %2538 = vpow2.f32 %v1358_v45  ;;  %v1356_v20 = vmul.f32 1.442695, %v1354_v31 }
 0x45c   : > { %v1473_v14 = vpop.xlane.xlu1 %1472  ;;  %v991_v2 = vsel %vm611_vm3, %v3015_v0, 0.0 }
 0x45d   : > { %v1477_v15 = vsub.f32 %v2958_v6, %v1473_v14  ;;  %992 = vadd.xlane.f32.xlu1 %v991_v2 }
 0x45f   : > { %v3020_v52 = vpop.eup %2532  ;;  %v1479_v18 = vmul.f32 1.442695, %v1477_v15 }
 0x460   : > { %v1114_v19 = vsel %vm611_vm3, %v3020_v52, 0.0  ;;  %v1003_v36 = vpop.permute.xlu1 %1002 }
 0x461   : > { %1115 = vadd.xlane.f32.xlu1 %v1114_v19  ;;  %2540 = vpow2.f32 %v1479_v18 }
 0x462   : > { %2542 = vpow2.f32 %v1481_v23 }
 0x463   : > { %v3025_v21 = vpop.eup %2534  ;;  %2544 = vpow2.f32 %v1356_v20 }
 0x464   : > { %v1237_v24 = vsel %vm611_vm3, %v3025_v21, 0.0  ;;  %v3029_v25 = vpop.eup %2536 }
 0x465   : > { %1238 = vadd.xlane.f32.xlu0 %v1237_v24  ;;  %v1240_v6 = vsel %vm611_vm3, %v3029_v25, 0.0  ;;  %v3033_v58 = vpop.eup %2538 }
 0x466   : > { %v1363_v27 = vsel %vm611_vm3, %v3033_v58, 0.0 }
 0x469   : > { %1241 = vadd.xlane.f32.xlu0 %v1240_v6 }
 0x46b   : > { %v3037_v8 = vpop.eup %2540 }
 0x46c   : > { %v1483_v29 = vsel %vm611_vm3, %v3037_v8, 0.0  ;;  %v3041_v30 = vpop.eup %2542 }
 0x46d   : > { %1364 = vadd.xlane.f32.xlu0 %v1363_v27  ;;  %v1486_v17 = vsel %vm611_vm3, %v3041_v30, 0.0  ;;  %v3050_v26 = vpop.eup %2544 }
 0x46e   : > { %v1360_v34 = vsel %vm611_vm3, %v3050_v26, 0.0 }
 0x471   : > { %1484 = vadd.xlane.f32.xlu0 %v1483_v29 }
 0x472   : > { %1125 = vrot.lane.b32.xlu1 %v2840_v46, %s2666_s30 }
 0x475   : > { %1487 = vadd.xlane.f32.xlu0 %v1486_v17 }
 0x48b   : > { %1248 = vrot.lane.b32.xlu0 %v2840_v46, %s2668_s18 }
 0x496   : > { %1361 = vadd.xlane.f32.xlu1 %v1360_v34 }
 0x4a7   : > { %1371 = vrot.lane.b32.xlu1 %v2840_v46, %s2670_s20  ;;  %s3324_s20 = smov 48  }
 0x4ab   : > { %1494 = vrot.lane.b32.xlu1 %v2840_v46, %s2672_s16 }
 0x4b1   : > { %v626_v4 = vpop.xlane.xlu1 %625 }
 0x4b2   : > { %2546 = vrcp.f32 %v626_v4 }
 0x4b3   : > { %v629_v39 = vpop.xlane.xlu0 %628 }
 0x4b4   : > { %2548 = vrcp.f32 %v629_v39 }
 0x4b7   : > { %v746_v32 = vpop.xlane.xlu1 %745 }
 0x4b8   : > { %2550 = vrcp.f32 %v746_v32 }
 0x4bb   : > { %v749_v42 = vpop.xlane.xlu0 %748 }
 0x4bc   : > { %2552 = vrcp.f32 %v749_v42  ;;  %v2547_v44 = vpop.eup %2546 }
 0x4bd   : > { %v632_v49 = vmul.f32 %v2547_v44, %v2973_v28 }
 0x4be   : > { %v2549_v38 = vpop.eup %2548 }
 0x4bf   : > { %v633_v50 = vmul.f32 %v2549_v38, %v2975_v13  ;;  %v873_v28 = vpop.xlane.xlu0 %872 }
 0x4c0   : > { %2554 = vrcp.f32 %v873_v28 }
 0x4c1   : > { %v634_v51 = vpack.c.bf16 %v633_v50, %v632_v49 }
 0x4c2   : > { %v2551_v46 = vpop.eup %2550 }
 0x4c3   : > { %2274 = vmatmul.mubr.msk.bf16.vlgmr.msra.gmra.mrb[8].mxu1 %vm611_vm3, %v634_v51  ;;  %v752_v54 = vmul.f32 %v2551_v46, %v2982_v33 }
 0x4c4   : > { %2284 = vmatpush3.bf16.msra.mxu1 %v3003_v48  ;;  %2285 = vmatprep.mubr.msk.bf16.mxu1 %vm2658_vm1, %v2657_v40  ;;  %v996_v48 = vpop.xlane.xlu0 %995 }
 0x4c5   : > { %2295 = vmatprep.subr.bf16.mxu1 %v2657_v40 }
 0x4c6   : > { %v2553_v53 = vpop.eup %2552 }
 0x4c7   : > { %v753_v55 = vmul.f32 %v2553_v53, %v2986_v35 }
 0x4c9   : > { %v754_v56 = vpack.c.bf16 %v753_v55, %v752_v54 }
 0x4ca   : > { %v2555_v59 = vpop.eup %2554 }
 0x4cb   : > { %2286 = vmatmul.mubr.msk.bf16.vlgmr.msra.gmra.mrb[12].mxu1 %vm611_vm3, %v754_v56  ;;  %v1119_v33 = vpop.xlane.xlu0 %1118  ;;  %v877_v63 = vmul.f32 %v2555_v59, %v2991_v41  ;;  %v2478_v59 = vld [vmem:[%s3304_s4] sm:$0xff]  }
 0x4cc   : > { %2296 = vmatpush3.bf16.msra.mxu1 %v880_v37  ;;  %2297 = vmatprep.mubr.msk.bf16.mxu1 %vm2658_vm1, %v2657_v40 }
 0x4cd   : > { %2307 = vmatprep.subr.bf16.mxu1 %v2657_v40  ;;  %2362 = vmatpush3.bf16.msra.mxu0 %v2478_v59 }
 0x4ce   : > { %2363 = vmatprep.subr.bf16.mxu0 %v2657_v40 }
 0x4e6   : > { %v870_v13 = vpop.xlane.xlu1 %869 }
 0x4e7   : > { %2556 = vrcp.f32 %v870_v13 }
 0x4ea   : > { %v993_v57 = vpop.xlane.xlu1 %992 }
 0x4eb   : > { %2558 = vrcp.f32 %v993_v57 }
 0x4ec   : > { %2560 = vrcp.f32 %v996_v48 }
 0x4ee   : > { %v1116_v35 = vpop.xlane.xlu1 %1115 }
 0x4ef   : > { %2562 = vrcp.f32 %v1116_v35 }
 0x4f0   : > { %2564 = vrcp.f32 %v1119_v33 }
 0x4f1   : > { %v2557_v61 = vpop.eup %2556 }
 0x4f2   : > { %v876_v1 = vmul.f32 %v2557_v61, %v3010_v60  ;;  %v1239_v3 = vpop.xlane.xlu0 %1238  ;;  %v1126_v12 = vpop.permute.xlu1 %1125 }
 0x4f4   : > { %v878_v5 = vpack.c.bf16 %v877_v63, %v876_v1 }
 0x4f5   : > { %v2559_v7 = vpop.eup %2558 }
 0x4f6   : > { %v1242_v9 = vpop.xlane.xlu0 %1241  ;;  %2298 = vmatmul.mubr.msk.bf16.vlgmr.msra.gmra.mrb[16].mxu1 %vm611_vm3, %v878_v5  ;;  %v2561_v62 = vpop.eup %2560  ;;  %v999_v10 = vmul.f32 %v2559_v7, %v3015_v0 }
 0x4f7   : > { %2308 = vmatpush3.bf16.msra.mxu1 %v1003_v36  ;;  %2309 = vmatprep.mubr.msk.bf16.mxu1 %vm2658_vm1, %v2657_v40  ;;  %v1000_v41 = vmul.f32 %v2561_v62, %v2995_v43  ;;  %2566 = vrcp.f32 %v1242_v9  ;;  %v2479_v9 = vld [vmem:[%s3304_s4 + $0x8] sm:$0xff]   ;;  %v2480_v62 = vld [vmem:[%s3304_s4 + $0x10] sm:$0xff]  }
 0x4f8   : > { %2319 = vmatprep.subr.bf16.mxu1 %v2657_v40  ;;  %2568 = vrcp.f32 %v1239_v3  ;;  %2364 = vmatpush3.bf16.msra.mxu0 %v2479_v9 }
 0x4f9   : > { %v1001_v11 = vpack.c.bf16 %v1000_v41, %v999_v10  ;;  %v2563_v45 = vpop.eup %2562  ;;  %2365 = vmatprep.subr.bf16.mxu0 %v2657_v40 }
 0x4fa   : > { %v1365_v60 = vpop.xlane.xlu0 %1364  ;;  %v2565_v2 = vpop.eup %2564  ;;  %v1122_v0 = vmul.f32 %v2563_v45, %v3020_v52 }
 0x4fb   : > { %v1123_v43 = vmul.f32 %v2565_v2, %v2999_v47  ;;  %2570 = vrcp.f32 %v1365_v60  ;;  %v2481_v60 = vld [vmem:[%s3304_s4 + $0x18] sm:$0xff]  }
 0x4fc   : > { %2366 = vmatpush3.bf16.msra.mxu0 %v2480_v62 }
 0x4fd   : > { %v1124_v16 = vpack.c.bf16 %v1123_v43, %v1122_v0  ;;  %2367 = vmatprep.subr.bf16.mxu0 %v2657_v40 }
 0x4fe   : > { %v1485_v14 = vpop.xlane.xlu0 %1484  ;;  %2310 = vmatmul.mubr.msk.bf16.vlgmr.msra.gmra.mrb[20].mxu1 %vm611_vm3, %v1001_v11 }
 0x4ff   : > { %2320 = vmatpush3.bf16.msra.mxu1 %v1126_v12  ;;  %2321 = vmatprep.mubr.msk.bf16.mxu1 %vm2658_vm1, %v2657_v40 }
 0x500   : > { %2331 = vmatprep.subr.bf16.mxu1 %v2657_v40  ;;  %2368 = vmatpush3.bf16.msra.mxu0 %v2481_v60 }
 0x501   : > { %v2567_v18 = vpop.eup %2566 }
 0x502   : > { %v1488_v15 = vpop.xlane.xlu0 %1487  ;;  %v2569_v23 = vpop.eup %2568  ;;  %v1246_v24 = vmul.f32 %v2567_v18, %v3029_v25 }
 0x503   : > { %v1245_v52 = vmul.f32 %v2569_v23, %v3025_v21 }
 0x505   : > { %v1247_v6 = vpack.c.bf16 %v1246_v24, %v1245_v52  ;;  %v2571_v25 = vpop.eup %2570 }
 0x506   : > { %v1249_v19 = vpop.permute.xlu0 %1248  ;;  %2322 = vmatmul.mubr.msk.bf16.vlgmr.msra.gmra.mrb[24].mxu1 %vm611_vm3, %v1124_v16  ;;  %v1369_v17 = vmul.f32 %v2571_v25, %v3033_v58 }
 0x507   : > { %2332 = vmatpush3.bf16.msra.mxu1 %v1249_v19  ;;  %2333 = vmatprep.mubr.msk.bf16.mxu1 %vm2658_vm1, %v2657_v40 }
 0x508   : > { %2343 = vmatprep.subr.bf16.mxu1 %v2657_v40 }
 0x50e   : > { %2334 = vmatmul.mubr.msk.bf16.vlgmr.msra.gmra.mrb[28].mxu1 %vm611_vm3, %v1247_v6 }
 0x50f   : > { %2345 = vmatprep.mubr.msk.bf16.mxu1 %vm2658_vm1, %v2657_v40 }
 0x523   : > { %v1362_v47 = vpop.xlane.xlu1 %1361 }
 0x524   : > { %2572 = vrcp.f32 %v1362_v47 }
 0x525   : > { %2574 = vrcp.f32 %v1488_v15 }
 0x526   : > { %2576 = vrcp.f32 %v1485_v14 }
 0x527   : > { %v1372_v27 = vpop.permute.xlu1 %1371 }
 0x528   : > { %2344 = vmatpush3.bf16.msra.mxu1 %v1372_v27 }
 0x529   : > { %2355 = vmatprep.subr.bf16.mxu1 %v2657_v40 }
 0x52b   : > { %v1495_v34 = vpop.permute.xlu1 %1494 }
 0x52e   : > { %v2573_v29 = vpop.eup %2572 }
 0x52f   : > { %v1368_v21 = vmul.f32 %v2573_v29, %v3050_v26  ;;  %v2575_v20 = vpop.eup %2574 }
 0x530   : > { %v2577_v36 = vpop.eup %2576  ;;  %v1492_v37 = vmul.f32 %v2575_v20, %v3041_v30 }
 0x531   : > { %v1370_v31 = vpack.c.bf16 %v1369_v17, %v1368_v21  ;;  %v1491_v4 = vmul.f32 %v2577_v36, %v3037_v8 }
 0x533   : > { %2346 = vmatmul.mubr.msk.bf16.vlgmr.msra.gmra.mrb[32].mxu1 %vm611_vm3, %v1370_v31  ;;  %v1493_v39 = vpack.c.bf16 %v1492_v37, %v1491_v4 }
 0x534   : > { %2356 = vmatpush3.bf16.msra.mxu1 %v1495_v34  ;;  %2357 = vmatprep.mubr.msk.bf16.mxu1 %vm2658_vm1, %v2657_v40 }
 0x53b   : > { %2358 = vmatmul.mubr.msk.bf16.vlgmr.msra.gmra.mrb[36].mxu1 %vm611_vm3, %v1493_v39 }
 0x53c   : > { %1842 = vmatprep.mubr.bf16.mxu1 %v2656_v22 }
 0x596   : > { %v3104_v58 = vpop.f32.mrb[8].mxu1 }
 0x597   : > { %v2275_v26 = vpop.f32.mrb[9].mxu1 }
 0x598   : > { %v3106_v32 = vpop.f32.mrb[10].mxu1 }
 0x599   : > { %v2276_v42 = vpop.f32.mrb[11].mxu1 }
 0x59e   : > { %v796_v44 = vpop.f32.mrb[12].mxu1 }
 0x59f   : > { %v2287_v38 = vpop.f32.mrb[13].mxu1 }
 0x5a0   : > { %v799_v49 = vpop.f32.mrb[14].mxu1 }
 0x5a1   : > { %v2431_v50 = vpack.i.bf16 %v799_v49, %v796_v44  ;;  %v2288_v51 = vpop.f32.mrb[15].mxu1 }
 0x5a3   : > { %2432 = vrot.lane.b32.xlu1 %v2431_v50, %s2673_s0 }
 0x5c9   : > { %v919_v30 = vpop.f32.mrb[16].mxu1 }
 0x5ca   : > { %v2299_v8 = vpop.f32.mrb[17].mxu1 }
 0x5cb   : > { %v922_v46 = vpop.f32.mrb[18].mxu1 }
 0x5cc   : > { %v2436_v53 = vpack.i.bf16 %v922_v46, %v919_v30  ;;  %v2300_v54 = vpop.f32.mrb[19].mxu1 }
 0x5ce   : > { %2437 = vrot.lane.b32.xlu1 %v2436_v53, %s2671_s15  ;;  %s3323_s15 = smov 40  }
 0x5d1   : > { %v1042_v22 = vpop.f32.mrb[20].mxu1 }
 0x5d2   : > { %v2311_v55 = vpop.f32.mrb[21].mxu1 }
 0x5d3   : > { %v1045_v56 = vpop.f32.mrb[22].mxu1  ;;  %v2165_v55 = vld [vmem:[%s3305_s5] ss:$0 sm:$0xff] }
 0x5d4   : > { %v2441_v28 = vpack.i.bf16 %v1045_v56, %v1042_v22  ;;  %v2312_v13 = vpop.f32.mrb[23].mxu1 }
 0x5d6   : > { %2442 = vrot.lane.b32.xlu1 %v2441_v28, %s2669_s26 }
 0x5d9   : > { %v1165_v48 = vpop.f32.mrb[24].mxu1 }
 0x5da   : > { %v2323_v57 = vpop.f32.mrb[25].mxu1 }
 0x5db   : > { %v1168_v33 = vpop.f32.mrb[26].mxu1  ;;  %v2590_v57 = vld [vmem:[%s2794_s19] sm:$0xff] }
 0x5dc   : > { %v2446_v35 = vpack.i.bf16 %v1168_v33, %v1165_v48  ;;  %v2324_v61 = vpop.f32.mrb[27].mxu1 }
 0x5dd   : > { %v2591_v61 = vld [vmem:[%s2794_s19 + $0x8] sm:$0xff] }
 0x5de   : > { %2447 = vrot.lane.b32.xlu1 %v2446_v35, %s2667_s17  ;;  %s404_s17 = sand.u32 1, %s2646_s22  }
 0x5df   : > { %s2135_s28 = sshll.u32 %s404_s17, 4 }
 0x5e0   : > { %s406_s16 = scalar_lea.vmem [#allocation2], %s2135_s28 }
 0x5e1   : > { %v1288_v63 = vpop.f32.mrb[28].mxu1  ;;  %s2069_s19 = sshll.u32 %s406_s16, 4  ;;  %s3255_s19 = int_to_ptr.vmem [resolvable:$true] %s2069_s19 }
 0x5e2   : > { %v2335_v1 = vpop.f32.mrb[29].mxu1  ;;  %s2592_s28 = scalar_lea.vmem %s3255_s19, 256 }
 0x5e3   : > { %v1291_v3 = vpop.f32.mrb[30].mxu1  ;;  %p2593_p11 = scmp.ne.s32.totalorder %s3255_s19, %s2592_s28 }
 0x5e4   : > { %v2451_v5 = vpack.i.bf16 %v1291_v3, %v1288_v63  ;;  %v2336_v7 = vpop.f32.mrb[31].mxu1 }
 0x5e5   : > { %p2594_p12 = pnand %p2593_p11, %p2779_p5 }
 0x5e6   : > { %2452 = vrot.lane.b32.xlu0 %v2451_v5, %s3323_s15  ;;  %s2205_s15 = sshll.u32 %s2762_s25, 8  ;;  %s3258_s25 = scalar_lea.sflag [#allocation3], %s404_s17 }
 0x5e7   : > { %s3251_s26 = scalar_lea.hbm %s3312_s12, %s2205_s15  ;;  %p2595_p13 = pneg %p2594_p12 }
 0x606   : > { %v1411_v10 = vpop.f32.mrb[32].mxu1 }
 0x607   : > { %v2347_v41 = vpop.f32.mrb[33].mxu1 }
 0x608   : > { %v1414_v11 = vpop.f32.mrb[34].mxu1 }
 0x609   : > { %v2456_v45 = vpack.i.bf16 %v1414_v11, %v1411_v10  ;;  %v2348_v12 = vpop.f32.mrb[35].mxu1 }
 0x60b   : > { %2457 = vrot.lane.b32.xlu1 %v2456_v45, %s3324_s20  ;;  %s2674_s20 = smov [#allocation2]  }
 0x60e   : > { %v1534_v14 = vpop.f32.mrb[36].mxu1 }
 0x60f   : > { %v2359_v2 = vpop.f32.mrb[37].mxu1 }
 0x610   : > { %v1537_v0 = vpop.f32.mrb[38].mxu1  ;;  %v2482_v2 = vld [vmem:[%s3308_s8] ss:$8 sps:$4 sm:$0xff]  }
 0x611   : > { %v2461_v43 = vpack.i.bf16 %v1537_v0, %v1534_v14  ;;  %v2360_v15 = vpop.f32.mrb[39].mxu1  ;;  %v2484_v14 = vld [vmem:[%s3308_s8 + $0x4] ss:$8 sps:$4 sm:$0xff]   ;;  %v2487_v0 = vld [vmem:[%s3308_s8 + $0x14] ss:$8 sps:$4 sm:$0xff]  }
 0x612   : > { %1810 = vmatprep.subr.bf16.mxu1 %v2484_v14  ;;  %v2490_v15 = vld [vmem:[%s3308_s8 + $0x24] ss:$8 sps:$4 sm:$0xff]  }
 0x613   : > { %2462 = vrot.lane.b32.xlu0 %v2461_v43, %s3325_s29  ;;  %1811 = vmatpush1.bf16.msra.mxu1 %v2482_v2  ;;  %v2485_v43 = vld [vmem:[%s3308_s8 + $0x10] ss:$8 sps:$4 sm:$0xff]   ;;  %s2596_s29 = sshll.u32 %s2674_s20, 4  ;;  %s2597_s29 = int_to_ptr.vmem [resolvable:$false] %s2596_s29 }
 0x614   : > { %1812 = vmatprep.subr.bf16.mxu1 %v2487_v0  ;;  %s2598_s15 = scalar_lea.vmem %s2597_s29, 512  ;;  %p2599_p0 = scmp.lt.s32.totalorder %s3255_s19, %s2597_s29 }
 0x615   : > { %v2433_v16 = vpop.permute.xlu1 %2432  ;;  %p2600_p1 = scmp.lt.s32.totalorder %s2598_s15, %s2592_s28 }
 0x616   : > { %v2435_v23 = vunpack.i.h.bf16 %v2433_v16  ;;  %v2434_v24 = vunpack.i.l.bf16 %v2433_v16  ;;  %v2488_v16 = vld [vmem:[%s3308_s8 + $0x20] ss:$8 sps:$4 sm:$0xff]  }
 0x617   : > { %1813 = vmatpush1.bf16.msra.mxu1 %v2485_v43  ;;  %p2601_p2 = por %p2600_p1, %p2599_p0 }
 0x618   : > { %v1598_v31 = vsel %vm561_vm2, %v3106_v32, %v2435_v23  ;;  %v1597_v20 = vsel %vm561_vm2, %v3104_v58, %v2434_v24  ;;  %1814 = vmatprep.subr.bf16.mxu1 %v2490_v15  ;;  %v2495_v23 = vld [vmem:[%s3310_s10] sm:$0xff]   ;;  %v2496_v24 = vld [vmem:[%s3310_s10 + $0x48] sm:$0xff]  }
 0x619   : > { %p2602_p3 = pnand %p2601_p2, %p2595_p13 }
 0x61b   : > { %1815 = vmatpush1.bf16.msra.mxu1 %v2488_v16 }
 0x640   : > { %v2438_v40 = vpop.permute.xlu1 %2437 }
 0x641   : > { %v2440_v52 = vunpack.i.h.bf16 %v2438_v40  ;;  %v2439_v6 = vunpack.i.l.bf16 %v2438_v40  ;;  %v2491_v40 = vld [vmem:[%s3308_s8 + $0x30] ss:$8 sps:$4 sm:$0xff]  }
 0x643   : > { %v1600_v37 = vsel %vm611_vm3, %v1598_v31, %v2440_v52  ;;  %v1599_v4 = vsel %vm611_vm3, %v1597_v20, %v2439_v6  ;;  %v2497_v52 = vld [vmem:[%s3310_s10 + $0x8] sm:$0xff]   ;;  %v2171_v20 = vld [vmem:[%s3306_s6] ss:$0 sm:$0xff] }
 0x648   : > { %v2443_v18 = vpop.permute.xlu1 %2442 }
 0x649   : > { %v2445_v27 = vunpack.i.h.bf16 %v2443_v18  ;;  %v2444_v25 = vunpack.i.l.bf16 %v2443_v18  ;;  %v2493_v18 = vld [vmem:[%s3308_s8 + $0x34] ss:$8 sps:$4 sm:$0xff]  }
 0x64a   : > { %1816 = vmatprep.subr.bf16.mxu1 %v2493_v18 }
 0x64b   : > { %v1603_v42 = vsel %vm1601_vm4, %v1600_v37, %v2445_v27  ;;  %v1602_v44 = vsel %vm1601_vm4, %v1599_v4, %v2444_v25  ;;  %1817 = vmatpush1.bf16.msra.mxu1 %v2491_v40  ;;  %v2172_v4 = vld [vmem:[%s3307_s7] ss:$0 sm:$0xff] }
 0x650   : > { %v2448_v19 = vpop.permute.xlu1 %2447 }
 0x651   : > { %v2450_v17 = vunpack.i.h.bf16 %v2448_v19  ;;  %v2449_v21 = vunpack.i.l.bf16 %v2448_v19  ;;  %v2494_v19 = vld [vmem:[%s3310_s10 + $0x40] sm:$0xff]  }
 0x652   : > { %2243 = vmatprep.subr.bf16.mxu0 %v2494_v19 }
 0x653   : > { %v1606_v38 = vsel %vm1604_vm5, %v1603_v42, %v2450_v17  ;;  %v1605_v32 = vsel %vm1604_vm5, %v1602_v44, %v2449_v21 }
 0x658   : > { %v2453_v47 = vpop.permute.xlu0 %2452 }
 0x659   : > { %v2455_v34 = vunpack.i.h.bf16 %v2453_v47  ;;  %v2454_v36 = vunpack.i.l.bf16 %v2453_v47 }
 0x65b   : > { %v1609_v58 = vsel %vm1607_vm6, %v1606_v38, %v2455_v34  ;;  %v1608_v50 = vsel %vm1607_vm6, %v1605_v32, %v2454_v36  ;;  %v2498_v38 = vld [vmem:[%s3310_s10 + $0x50] sm:$0xff]  }
 0x65c   : > { %v2499_v32 = vld [vmem:[%s3310_s10 + $0x10] sm:$0xff]  }
 0x67d   : > { %v2458_v29 = vpop.permute.xlu1 %2457 }
 0x67e   : > { %v2460_v39 = vunpack.i.h.bf16 %v2458_v29  ;;  %v2459_v26 = vunpack.i.l.bf16 %v2458_v29 }
 0x680   : > { %v1612_v8 = vsel %vm1610_vm7, %v1609_v58, %v2460_v39  ;;  %v1611_v46 = vsel %vm1610_vm7, %v1608_v50, %v2459_v26  ;;  %v2501_v58 = vld [vmem:[%s3310_s10 + $0x18] sm:$0xff]   ;;  %v2502_v50 = vld [vmem:[%s3310_s10 + $0x60] sm:$0xff]  }
 0x685   : > { %v2463_v49 = vpop.permute.xlu0 %2462 }
 0x686   : > { %v2465_v51 = vunpack.i.h.bf16 %v2463_v49  ;;  %v2464_v30 = vunpack.i.l.bf16 %v2463_v49  ;;  %v2500_v49 = vld [vmem:[%s3310_s10 + $0x58] sm:$0xff]  }
 0x688   : > { %v1615_v53 = vsel %vm1613_vm8, %v1612_v8, %v2465_v51  ;;  %v1614_v54 = vsel %vm1613_vm8, %v1611_v46, %v2464_v30  ;;  %v2503_v51 = vld [vmem:[%s3310_s10 + $0x20] sm:$0xff]   ;;  %v2504_v30 = vld [vmem:[%s3310_s10 + $0x68] sm:$0xff]   ;;  %v2506_v46 = vld [vmem:[%s3310_s10 + $0x70] sm:$0xff]  }
 0x689   : > { %v1616_v22 = vpack.c.bf16 %v1615_v53, %v1614_v54  ;;  %v2505_v8 = vld [vmem:[%s3310_s10 + $0x28] sm:$0xff]   ;;  %v2507_v53 = vld [vmem:[%s3310_s10 + $0x30] sm:$0xff]   ;;  %v2508_v54 = vld [vmem:[%s3310_s10 + $0x78] sm:$0xff]  }
 0x68b   : > { %2370 = vmatmul.mubr.msk.bf16.vlgmr.msra.gmra.mrb[28].mxu0 %vm415_vm0, %v1616_v22  ;;  %v2509_v22 = vld [vmem:[%s3310_s10 + $0x38] sm:$0xff]  }
 0x68c   : > { %2244 = vmatpush3.bf16.msra.mxu0 %v2495_v23 }
 0x68d   : > { %2245 = vmatprep.subr.bf16.mxu0 %v2496_v24 }
 0x690   : > { %2246 = vmatpush3.bf16.msra.mxu0 %v2497_v52 }
 0x691   : > { %2247 = vmatprep.subr.bf16.mxu0 %v2498_v38 }
 0x694   : > { %2248 = vmatpush3.bf16.msra.mxu0 %v2499_v32 }
 0x695   : > { %2249 = vmatprep.subr.bf16.mxu0 %v2500_v49 }
 0x698   : > { %2250 = vmatpush3.bf16.msra.mxu0 %v2501_v58 }
 0x699   : > { %2251 = vmatprep.subr.bf16.mxu0 %v2502_v50 }
 0x69c   : > { %2252 = vmatpush3.bf16.msra.mxu0 %v2503_v51 }
 0x69d   : > { %2253 = vmatprep.subr.bf16.mxu0 %v2504_v30 }
 0x6a0   : > { %2254 = vmatpush3.bf16.msra.mxu0 %v2505_v8 }
 0x6a1   : > { %2255 = vmatprep.subr.bf16.mxu0 %v2506_v46 }
 0x6a4   : > { %2256 = vmatpush3.bf16.msra.mxu0 %v2507_v53 }
 0x6a5   : > { %2257 = vmatprep.subr.bf16.mxu0 %v2508_v54 }
 0x6a8   : > { %2258 = vmatpush3.bf16.msra.mxu0 %v2509_v22 }
 0x75e   : > { %v1693_v56 = vpop.f32.mrb[28].mxu0 }
 0x75f   : > { %v1694_v28 = vadd.f32 %v2165_v55, %v1693_v56  ;;  %v2371_v13 = vpop.f32.mrb[29].mxu0 }
 0x760   : > { %v1696_v48 = vpop.f32.mrb[30].mxu0  ;;  %v1755_v13 = vld [vmem:[%s3309_s9] sm:$0x3] }
 0x761   : > { %v3147_v33 = vadd.f32 %v2590_v57, %v1694_v28  ;;  %v1697_v59 = vadd.f32 %v2165_v55, %v1696_v48  ;;  %v2372_v35 = vpop.f32.mrb[31].mxu0  ;;  %v1757_v55 = vlaneseq }
 0x763   : > { %v3150_v63 = vadd.f32 %v2591_v61, %v1697_v59  ;;  %v1702_v1 = vsel %vm415_vm0, %v3147_v33, 0.0  ;;  %v1758_v56 = vshrl.u32 %v1757_v55, 7 }
 0x764   : > { %1703 = vadd.xlane.f32.xlu1 %v1702_v1 }
 0x765   : > { %v1705_v3 = vsel %vm415_vm0, %v3150_v63, 0.0  ;;  %v1759_v28 = vsub.s32 0, %v1758_v56  ;;  %v1763_v48 = vsub.s32 1, %v1758_v56 }
 0x766   : > { %1706 = vadd.xlane.f32.xlu0 %v1705_v3 }
 0x767   : > { %v1760_v57 = vrot.slane %v1755_v13, %v1759_v28  ;;  %v1764_v59 = vrot.slane %v1755_v13, %v1763_v48 }
 0x7f1   : > { %v1704_v5 = vpop.xlane.xlu1 %1703 }
 0x7f2   : > { %v1708_v7 = vmul.f32 0.015625, %v1704_v5 }
 0x7f3   : > { %v1707_v9 = vpop.xlane.xlu0 %1706 }
 0x7f4   : > { %v1710_v62 = vsub.f32 %v3147_v33, %v1708_v7  ;;  %v1709_v10 = vmul.f32 0.015625, %v1707_v9 }
 0x7f6   : > { %v1711_v41 = vsub.f32 %v3150_v63, %v1709_v10  ;;  %v1712_v60 = vmul.f32 %v1710_v62, %v1710_v62 }
 0x7f8   : > { %v1714_v11 = vsel %vm415_vm0, %v1712_v60, 0.0  ;;  %v1713_v45 = vmul.f32 %v1711_v41, %v1711_v41 }
 0x7f9   : > { %1715 = vadd.xlane.f32.xlu0 %v1714_v11 }
 0x7fa   : > { %v1717_v12 = vsel %vm415_vm0, %v1713_v45, 0.0 }
 0x7fd   : > { %1718 = vadd.xlane.f32.xlu0 %v1717_v12 }
 0x886   : > { %v1716_v6 = vpop.xlane.xlu0 %1715 }
 0x887   : > { %v1720_v47 = vmul.f32 0.015625, %v1716_v6 }
 0x889   : > { %v1722_v27 = vadd.f32 1e-05, %v1720_v47 }
 0x88a   : > { %v1719_v25 = vpop.xlane.xlu0 %1718 }
 0x88b   : > { %2578 = vrsqrt.f32 %v1722_v27  ;;  %v1721_v29 = vmul.f32 0.015625, %v1719_v25 }
 0x88d   : > { %v1723_v17 = vadd.f32 1e-05, %v1721_v29 }
 0x88f   : > { %2580 = vrsqrt.f32 %v1723_v17  ;;  %v2182_v17 = vld [vmem:[%s3311_s11] ss:$0 sm:$0xff] }
 0x895   : > { %v2579_v21 = vpop.eup %2578 }
 0x896   : > { %v1726_v31 = vmul.f32 %v2579_v21, %v1710_v62 }
 0x898   : > { %v1735_v36 = vmul.f32 %v2171_v20, %v1726_v31 }
 0x899   : > { %v2581_v34 = vpop.eup %2580 }
 0x89a   : > { %v1727_v37 = vmul.f32 %v2581_v34, %v1711_v41  ;;  %v1744_v26 = vadd.f32 %v2172_v4, %v1735_v36 }
 0x89c   : > { %v1736_v39 = vmul.f32 %v2171_v20, %v1727_v37 }
 0x89e   : > { %v1745_v42 = vadd.f32 %v2172_v4, %v1736_v39 }
 0x8a0   : > { %v1746_v44 = vpack.c.bf16 %v1745_v42, %v1744_v26 }
 0x8a2   : > { %2181 = vmatmul.mubr.msk.bf16.vlgmr.msra.gmra.mrb[40].mxu1 %vm415_vm0, %v1746_v44 }
 0x975   : > { %v1844_v35 = vpop.f32.mrb[40].mxu1 }
 0x976   : > { %v1845_v61 = vadd.f32 %v1844_v35, %v1760_v57  ;;  %v1846_v1 = vpop.f32.mrb[41].mxu1 }
 0x977   : > { %v1847_v3 = vadd.f32 %v1846_v1, %v1764_v59  ;;  %v1848_v5 = vpop.f32.mrb[42].mxu1 }
 0x978   : > { %v1857_v7 = vmul.f32 0.70710677, %v1845_v61  ;;  %v1849_v9 = vadd.f32 %v1848_v5, %v1760_v57  ;;  %v1850_v62 = vpop.f32.mrb[43].mxu1  ;;  %v1853_v15 = vmul.f32 0.5, %v1845_v61 }
 0x979   : > { %v1858_v10 = vmul.f32 0.70710677, %v1847_v3  ;;  %v1851_v41 = vadd.f32 %v1850_v62, %v1764_v59  ;;  %v1854_v18 = vmul.f32 0.5, %v1847_v3 }
 0x97a   : > { %2582 = verf.f32 %v1857_v7  ;;  %v1859_v60 = vmul.f32 0.70710677, %v1849_v9  ;;  %v1855_v16 = vmul.f32 0.5, %v1849_v9 }
 0x97b   : > { %2584 = verf.f32 %v1858_v10  ;;  %v1860_v11 = vmul.f32 0.70710677, %v1851_v41  ;;  %v1856_v19 = vmul.f32 0.5, %v1851_v41 }
 0x97c   : > { %2586 = verf.f32 %v1859_v60 }
 0x97d   : > { %2588 = verf.f32 %v1860_v11 }
 0x984   : > { %v2583_v45 = vpop.eup %2582 }
 0x985   : > { %v2585_v12 = vpop.eup %2584  ;;  %v1865_v14 = vadd.f32 1.0, %v2583_v45 }
 0x986   : > { %v2587_v2 = vpop.eup %2586  ;;  %v1866_v0 = vadd.f32 1.0, %v2585_v12 }
 0x987   : > { %v2589_v43 = vpop.eup %2588  ;;  %v1867_v40 = vadd.f32 1.0, %v2587_v2  ;;  %v1869_v24 = vmul.f32 %v1865_v14, %v1853_v15 }
 0x988   : > { %v1868_v23 = vadd.f32 1.0, %v2589_v43  ;;  %v1870_v6 = vmul.f32 %v1866_v0, %v1854_v18 }
 0x989   : > { %v1871_v52 = vmul.f32 %v1867_v40, %v1855_v16 }
 0x98a   : > { %v1872_v47 = vmul.f32 %v1868_v23, %v1856_v19 }
 0x98b   : > { %v1873_v27 = vpack.c.bf16 %v1871_v52, %v1869_v24 }
 0x98c   : > { %v1874_v25 = vpack.c.bf16 %v1872_v47, %v1870_v6 }
 0x98e   : > { %2042 = vmatprep.mubr.bf16.mxu0 %v1874_v25 }
 0x98f   : > { %2043 = vmatmul.mubr.bf16.vlgmr.msra.gmra.mrb[32].mxu0 %v1873_v27 }
 0xa62   : > { %v2259_v29 = vpop.f32.mrb[32].mxu0 }
 0xa63   : > { %v2260_v21 = vpop.f32.mrb[33].mxu0 }
 0xa64   : > { %v2261_v31 = vadd.f32 %v2260_v21, %v2259_v29  ;;  %v2262_v20 = vpop.f32.mrb[34].mxu0 }
 0xa65   : > { %v2263_v34 = vpop.f32.mrb[35].mxu0 }
 0xa66   : > { %v2045_v36 = vadd.f32 %v2261_v31, %v2182_v17  ;;  %v2264_v37 = vadd.f32 %v2263_v34, %v2262_v20 }
 0xa68   : > { %v2051_v4 = vadd.f32 %v2045_v36, %v3147_v33  ;;  %v2048_v39 = vadd.f32 %v2264_v37, %v2182_v17 }
 0xa6a   : > { %2053 = vst.msk [vmem:[%s406_s16] sm:$0xff] %vm415_vm0, %v2051_v4  ;;  %v2052_v26 = vadd.f32 %v2048_v39, %v3150_v63 }
 0xa6c   : > { %2054 = vst.msk [vmem:[%s406_s16 + $0x8] sm:$0xff] %vm415_vm0, %v2052_v26 }
 0xa6d   : > { %2605 = shalt.err (!%p2602_p3)
}
 0xa6e   : > { %s2606_s17 = scalar_lea.hbm %s3251_s26, 256  ;;  %s2610_s18 = scalar_lea.hbm %s3312_s12, 512 }
 0xa6f   : > { %p2607_p4 = scmp.ne.s32.totalorder %s3251_s26, %s2606_s17  ;;  %p2611_p9 = scmp.lt.u32.totalorder %s3251_s26, %s3312_s12 }
 0xa70   : > { %p2612_p10 = scmp.lt.u32.totalorder %s2610_s18, %s2606_s17  ;;  %p2614_p12 = scmp.lt.u32.totalorder %s2606_s17, %s3251_s26 }
 0xa71   : > { %p2608_p7 = pnand %p2607_p4, %p2779_p5 }
 0xa72   : > { %p2613_p11 = por %p2612_p10, %p2611_p9 }
 0xa73   : > { %p2609_p8 = pneg %p2608_p7 }
 0xa74   : > { %p2615_p13 = por %p2614_p12, %p2613_p11 }
 0xa76   : > { %p2616_p0 = pnand %p2615_p13, %p2609_p8 }
 0xa78   : > { %2619 = shalt.err (!%p2616_p0)
}
 0xa79   : > { %s2675_s28 = smov 128  }
 0xa7a   : > { %2373 = dma.vmem_to_hbm [thread:$0]  (%p2779_p5), %s3255_s19, 256, %s3251_s26, %s3258_s25, %s2675_s28, %s2675_s28, %s2673_s0  }
 0xa7b PF: > { %p2379_p1 = scmp.ge.s32.totalorder %s2654_s24, 2  ;;  %s2084_s15 = sand.u32 1, %s2642_s21  }
 0xa7c   : > { %s2085_s17 = scalar_lea.sflag [#allocation3], %s2084_s15 }
 0xa7d   : > { %p2376_p2 = pnand %p2379_p1, %p2783_p6 }
 0xa7f   : > { %2637 = dma.done.wait (!%p2376_p2), %s2085_s17, 256  }
 0xa80   : > { %2639 = vsyncadd (!%p2376_p2), %s2085_s17, 4294967040  ;;  %s3326_s13 = sld [smem:[#allocation5_spill]]  ;;  %p22_p3 = scmp.ge.s32.totalorder %s2766_s27, 4  }
 0xa81   : > { %s3327_s21 = smov %s2646_s22  ;;  %s3328_s22 = smov %s2650_s23 }
 0xa82   : > { %s3330_s24 = smov %s2766_s27  ;;  %24 = sbr.rel (!%p22_p3) target bundleno = 5 (0x5), region = 103 }
 0xa86   : > { %s3329_s23 = smov %s3326_s13 }
 0xa89   :  { %2090 = vsyncpa [#allocation3], 1 }
 0xa8a   :  { %2092 = vsyncpa [#allocation3 + $0x1], 1 }

</bundles_post_ra>
